<compile_context>
chip_gen: v6e
topology: v6e:2x2x1
jax: 0.10.0
libtpu: 0.0.40
codegen_flags: <defaults>
</compile_context>

<pallas_src>
import functools
import numpy as np
import jax
import jax.numpy as jnp
from jax.experimental import pallas as pl
from jax.experimental.pallas import tpu as pltpu


# ----------------------------- helpers -----------------------------

def _row_tile(M, cap=256):
    """Largest row tile (multiple of 8, <=cap) dividing M; else full M."""
    for t in (256, 128, 64, 32, 16, 8):
        if t <= cap and M % t == 0:
            return t
    return M


# Scoped-VMEM budget safe on v5e/v6e (128 MiB) with headroom on v7x (64 MiB).
# Row / batch grid axes are independent -> "parallel" (sharded across the two
# TensorCores on v7x, harmless elsewhere).
_CP_PAR = pltpu.CompilerParams(dimension_semantics=("parallel",),
                               vmem_limit_bytes=32 * 1024 * 1024)


# ----------------------------- Pallas kernels -----------------------------

def _attn_layer_kernel(*refs, H, inv_temp, eps, has_mask):
    """Fused QKV proj + MHA + fc + residual + LayerNorm for one batch element.

    refs = (x, [mask], wq, wk, wv, bq, bk, bv, w_fc, b_fc, gamma, beta,
            out, attn_out)
    """
    if has_mask:
        (x_ref, mask_ref, wq_ref, wk_ref, wv_ref, bq_ref, bk_ref, bv_ref,
         wfc_ref, bfc_ref, g_ref, b_ref, o_ref, attn_ref) = refs
    else:
        (x_ref, wq_ref, wk_ref, wv_ref, bq_ref, bk_ref, bv_ref,
         wfc_ref, bfc_ref, g_ref, b_ref, o_ref, attn_ref) = refs

    x = x_ref[0]                                   # (L, d_model) bf16
    L = x.shape[0]
    d_model = o_ref.shape[-1]
    if has_mask:
        # TODO(synk): mask is carried as f32 (1.0 = masked); an int8/bool mask
        # would cut mask DMA bytes 4x.
        m = mask_ref[0] > 0.5                      # (L, L) bool

    # fc output accumulated across heads -> one lane-dense store at the end.
    acc = jnp.zeros((L, d_model), jnp.float32)

    for h in range(H):                             # leading-axis weight slices
        q = jnp.dot(x, wq_ref[h], preferred_element_type=jnp.float32) + bq_ref[h]
        k = jnp.dot(x, wk_ref[h], preferred_element_type=jnp.float32) + bk_ref[h]
        v = jnp.dot(x, wv_ref[h], preferred_element_type=jnp.float32) + bv_ref[h]

        s = jnp.einsum('qd,kd->qk', q.astype(jnp.bfloat16),
                       k.astype(jnp.bfloat16),
                       preferred_element_type=jnp.float32) * inv_temp
        if has_mask:
            s = jnp.where(m, -1000000000.0, s)     # masked_fill(mask, -1e9)
        s = s - jnp.max(s, axis=-1, keepdims=True) # stable softmax
        e = jnp.exp(s)
        a = e / jnp.sum(e, axis=-1, keepdims=True) # exact recip (attn returned)

        attn_ref[0, h] = a.astype(attn_ref.dtype)  # contiguous (L, L) slab

        ctx = jnp.dot(a.astype(jnp.bfloat16), v.astype(jnp.bfloat16),
                      preferred_element_type=jnp.float32)        # (L, d_v)
        acc = acc + jnp.dot(ctx.astype(jnp.bfloat16), wfc_ref[h],
                            preferred_element_type=jnp.float32)  # (L, d_model)

    y = acc + bfc_ref[...] + x.astype(jnp.float32)               # fc bias + residual
    mu = jnp.mean(y, axis=-1, keepdims=True)
    var = jnp.mean(jnp.square(y - mu), axis=-1, keepdims=True)
    o_ref[0] = ((y - mu) * jax.lax.rsqrt(var + eps) * g_ref[...]
                + b_ref[...]).astype(o_ref.dtype)


def _ffn_ln_kernel(x_ref, w1_ref, b1_ref, w2_ref, b2_ref, g_ref, bb_ref,
                   *rest, eps, final_eps, has_final):
    """y = LN(relu(x@W1+b1)@W2 + b2 + x); optionally also the final encoder LN."""
    if has_final:
        fg_ref, fb_ref, o_ref = rest
    else:
        (o_ref,) = rest

    x = x_ref[...]                                               # (tm, d) bf16
    h = jnp.dot(x, w1_ref[...], preferred_element_type=jnp.float32) + b1_ref[...]
    h = jnp.maximum(h, 0.0)
    y = jnp.dot(h.astype(jnp.bfloat16), w2_ref[...],
                preferred_element_type=jnp.float32) + b2_ref[...]
    y = y + x.astype(jnp.float32)
    mu = jnp.mean(y, axis=-1, keepdims=True)
    var = jnp.mean(jnp.square(y - mu), axis=-1, keepdims=True)
    y = (y - mu) * jax.lax.rsqrt(var + eps) * g_ref[...] + bb_ref[...]
    if has_final:                                                # final encoder LN
        mu = jnp.mean(y, axis=-1, keepdims=True)
        var = jnp.mean(jnp.square(y - mu), axis=-1, keepdims=True)
        y = (y - mu) * jax.lax.rsqrt(var + final_eps) * fg_ref[...] + fb_ref[...]
    o_ref[...] = y.astype(o_ref.dtype)


# ----------------------------- kernel wrappers -----------------------------

def attn_layer(x, mask, p, n_head, d_k, d_v, eps=1e-5):
    B, L, d_model = x.shape
    has_mask = mask is not None
    kernel = functools.partial(_attn_layer_kernel, H=n_head,
                               inv_temp=float(1.0 / np.sqrt(d_k)),
                               eps=eps, has_mask=has_mask)

    in_specs = [pl.BlockSpec((1, L, d_model), lambda b: (b, 0, 0))]
    args = [x]
    if has_mask:
        in_specs.append(pl.BlockSpec((1, L, L), lambda b: (b, 0, 0)))
        args.append(mask)
    # TODO(synk): weight index_maps are constant; pl.Buffered(1) single-buffering
    # would halve their VMEM footprint on v7x (kept default for portability).
    in_specs += [
        pl.BlockSpec((n_head, d_model, d_k), lambda b: (0, 0, 0)),   # wq
        pl.BlockSpec((n_head, d_model, d_k), lambda b: (0, 0, 0)),   # wk
        pl.BlockSpec((n_head, d_model, d_v), lambda b: (0, 0, 0)),   # wv
        pl.BlockSpec((n_head, 1, d_k), lambda b: (0, 0, 0)),         # bq
        pl.BlockSpec((n_head, 1, d_k), lambda b: (0, 0, 0)),         # bk
        pl.BlockSpec((n_head, 1, d_v), lambda b: (0, 0, 0)),         # bv
        pl.BlockSpec((n_head, d_v, d_model), lambda b: (0, 0, 0)),   # w_fc
        pl.BlockSpec((1, d_model), lambda b: (0, 0)),                # b_fc
        pl.BlockSpec((1, d_model), lambda b: (0, 0)),                # gamma
        pl.BlockSpec((1, d_model), lambda b: (0, 0)),                # beta
    ]
    args += [p["wq"], p["wk"], p["wv"], p["bq"], p["bk"], p["bv"],
             p["w_fc"], p["b_fc"], p["ln_attn_g"], p["ln_attn_b"]]

    y, attn = pl.pallas_call(
        kernel,
        out_shape=(jax.ShapeDtypeStruct((B, L, d_model), jnp.bfloat16),
                   jax.ShapeDtypeStruct((B, n_head, L, L), jnp.bfloat16)),
        grid=(B,),
        in_specs=in_specs,
        out_specs=(pl.BlockSpec((1, L, d_model), lambda b: (b, 0, 0)),
                   pl.BlockSpec((1, n_head, L, L), lambda b: (b, 0, 0, 0))),
        compiler_params=_CP_PAR,
    )(*args)
    return y, attn


def ffn_ln(x2, p, final_ln=None, eps=1e-5, final_eps=1e-6):
    M, d_model = x2.shape
    d_hid = p["w1"].shape[1]
    tm = _row_tile(M)
    has_final = final_ln is not None
    kernel = functools.partial(_ffn_ln_kernel, eps=eps, final_eps=final_eps,
                               has_final=has_final)

    in_specs = [pl.BlockSpec((tm, d_model), lambda i: (i, 0)),
                pl.BlockSpec((d_model, d_hid), lambda i: (0, 0)),
                pl.BlockSpec((1, d_hid), lambda i: (0, 0)),
                pl.BlockSpec((d_hid, d_model), lambda i: (0, 0)),
                pl.BlockSpec((1, d_model), lambda i: (0, 0)),
                pl.BlockSpec((1, d_model), lambda i: (0, 0)),
                pl.BlockSpec((1, d_model), lambda i: (0, 0))]
    args = [x2, p["w1"], p["b1"], p["w2"], p["b2"], p["ln_ffn_g"], p["ln_ffn_b"]]
    out_dtype = jnp.bfloat16
    if has_final:
        in_specs += [pl.BlockSpec((1, d_model), lambda i: (0, 0)),
                     pl.BlockSpec((1, d_model), lambda i: (0, 0))]
        args += [final_ln[0], final_ln[1]]
        out_dtype = jnp.float32       # final encoder output in f32

    return pl.pallas_call(
        kernel,
        out_shape=jax.ShapeDtypeStruct((M, d_model), out_dtype),
        grid=(M // tm,),
        in_specs=in_specs,
        out_specs=pl.BlockSpec((tm, d_model), lambda i: (i, 0)),
        compiler_params=_CP_PAR,
    )(*args)


# ----------------------------- model (glue) -----------------------------

def _sinusoid_table(n_position, d_hid):
    pos = np.arange(n_position)[:, None].astype(np.float64)
    j = np.arange(d_hid)[None, :]
    angle = pos / np.power(10000.0, 2.0 * (j // 2) / d_hid)
    table = np.zeros_like(angle)
    table[:, 0::2] = np.sin(angle[:, 0::2])
    table[:, 1::2] = np.cos(angle[:, 1::2])
    return table.astype(np.float32)


def positional_encoding_2d_table(d_word_vec):
    d_half = d_word_vec // 2
    tab_h = _sinusoid_table(8, d_half)                  # (8, d/2)
    tab_w = _sinusoid_table(24, d_half)                 # (24, d/2)
    h_br = np.repeat(tab_h[:, None, :], 24, axis=1)     # (8, 24, d/2)
    w_br = np.repeat(tab_w[None, :, :], 8, axis=0)      # (8, 24, d/2)
    tab = np.concatenate([h_br, w_br], axis=2)          # (8, 24, d)
    return jnp.asarray(tab.reshape(-1, d_word_vec))     # (192, d)


def encoder_layer(x, mask, p, n_head, d_k, d_v, final_ln=None):
    B, L, d_model = x.shape
    y, attn = attn_layer(x, mask, p, n_head, d_k, d_v)         # attn: (B,H,L,L)
    out2 = ffn_ln(y.reshape(B * L, d_model), p, final_ln=final_ln)
    return out2.reshape(B, L, d_model), attn


def transformer_encoder(enc_input, src_mask, params, n_head, d_k, d_v):
    B, L, d_model = enc_input.shape

    # positional encoding (+ dropout = identity); bf16 activations between kernels
    x = (enc_input + params["pos_table"][None, :L, :]).astype(jnp.bfloat16)

    # no-mask specialization: when src_mask is None nothing is fabricated/DMA'd.
    mask = None if src_mask is None else src_mask.astype(jnp.float32)

    n_layers = len(params["layers"])
    attn_list = []
    for li, layer_p in enumerate(params["layers"]):
        final_ln = ((params["ln_g"], params["ln_b"])
                    if li == n_layers - 1 else None)            # fold final LN
        x, attn = encoder_layer(x, mask, layer_p, n_head, d_k, d_v,
                                final_ln=final_ln)
        # reference layout: (n_head, batch, len_q, len_q)
        attn_list.append(jnp.transpose(attn, (1, 0, 2, 3)))
    return attn_list, x


# ----------------------------- parameter init -----------------------------

def init_params(key, n_layers, d_model, d_inner, n_head, d_k, d_v):
    params = {"pos_table": positional_encoding_2d_table(d_model),
              "ln_g": jnp.ones((1, d_model), jnp.float32),
              "ln_b": jnp.zeros((1, d_model), jnp.float32),
              "layers": []}
    for _ in range(n_layers):
        key, *ks = jax.random.split(key, 7)
        std_qk = float(np.sqrt(2.0 / (d_model + d_k)))
        std_v = float(np.sqrt(2.0 / (d_model + d_v)))
        std_fc = float(np.sqrt(2.0 / (n_head * d_v + d_model)))
        std_w1 = float(np.sqrt(2.0 / (d_model + d_inner)))
        layer = {
            # head-major weights (H, d_model, d_k/d_v): sliced on leading axis
            "wq": (jax.random.normal(ks[0], (n_head, d_model, d_k))
                   * std_qk).astype(jnp.bfloat16),
            "wk": (jax.random.normal(ks[1], (n_head, d_model, d_k))
                   * std_qk).astype(jnp.bfloat16),
            "wv": (jax.random.normal(ks[2], (n_head, d_model, d_v))
                   * std_v).astype(jnp.bfloat16),
            "bq": jnp.zeros((n_head, 1, d_k), jnp.float32),
            "bk": jnp.zeros((n_head, 1, d_k), jnp.float32),
            "bv": jnp.zeros((n_head, 1, d_v), jnp.float32),
            "w_fc": (jax.random.normal(ks[3], (n_head, d_v, d_model))
                     * std_fc).astype(jnp.bfloat16),
            "b_fc": jnp.zeros((1, d_model), jnp.float32),
            "ln_attn_g": jnp.ones((1, d_model), jnp.float32),
            "ln_attn_b": jnp.zeros((1, d_model), jnp.float32),
            "w1": (jax.random.normal(ks[4], (d_model, d_inner))
                   * std_w1).astype(jnp.bfloat16),
            "b1": jnp.zeros((1, d_inner), jnp.float32),
            "w2": (jax.random.normal(ks[5], (d_inner, d_model))
                   * std_w1).astype(jnp.bfloat16),
            "b2": jnp.zeros((1, d_model), jnp.float32),
            "ln_ffn_g": jnp.ones((1, d_model), jnp.float32),
            "ln_ffn_b": jnp.zeros((1, d_model), jnp.float32),
        }
        params["layers"].append(layer)
    return params


# ----------------------------- main -----------------------------

if __name__ == "__main__":
    # small config consistent with the module's structure
    B, L = 2, 8                      # seq length must be <= 8*24 = 192
    d_model = 32                     # d_word_vec == d_model, even (pos-enc split)
    n_head, d_k, d_v = 4, 8, 8
    d_inner = 64
    n_layers = 2

    key = jax.random.PRNGKey(0)
    k_in, k_par = jax.random.split(key)
    enc_input = jax.random.normal(k_in, (B, L, d_model), jnp.float32)
    params = init_params(k_par, n_layers, d_model, d_inner, n_head, d_k, d_v)

    # TODO(synk): dropout layers are identity here (inference mode).
    fwd = jax.jit(functools.partial(transformer_encoder,
                                    n_head=n_head, d_k=d_k, d_v=d_v))

    # 1) no-mask path (specialized kernel: no mask DMA / select)
    attn_list, enc_output = fwd(enc_input, None, params)
    jax.block_until_ready(enc_output)
    for a in attn_list:
        jax.block_until_ready(a)

    # 2) masked path (mask==True -> position is masked_fill'ed with -1e9)
    src_mask = jnp.broadcast_to(jnp.triu(jnp.ones((L, L), jnp.bool_), k=1),
                                (B, L, L))
    attn_list_m, enc_output_m = fwd(enc_input, src_mask, params)
    jax.block_until_ready(enc_output_m)

    assert enc_output.shape == (B, L, d_model)
    assert enc_output.dtype == jnp.float32
    assert all(a.shape == (n_head, B, L, L) for a in attn_list)
    assert bool(jnp.all(jnp.isfinite(enc_output)))
    assert enc_output_m.shape == (B, L, d_model)
    assert all(a.shape == (n_head, B, L, L) for a in attn_list_m)
    assert bool(jnp.all(jnp.isfinite(enc_output_m)))
    print("KERNEL_OK")
</pallas_src>

<mosaic_0001>
module attributes {stable_mosaic.version = 11 : i64} {
  func.func @_attn_layer_kernel(%arg0: i32, %arg1: memref<1x8x32xbf16, #tpu.memory_space<vmem>>, %arg2: memref<4x32x8xbf16, #tpu.memory_space<vmem>>, %arg3: memref<4x32x8xbf16, #tpu.memory_space<vmem>>, %arg4: memref<4x32x8xbf16, #tpu.memory_space<vmem>>, %arg5: memref<4x1x8xf32, #tpu.memory_space<vmem>>, %arg6: memref<4x1x8xf32, #tpu.memory_space<vmem>>, %arg7: memref<4x1x8xf32, #tpu.memory_space<vmem>>, %arg8: memref<4x8x32xbf16, #tpu.memory_space<vmem>>, %arg9: memref<1x32xf32, #tpu.memory_space<vmem>>, %arg10: memref<1x32xf32, #tpu.memory_space<vmem>>, %arg11: memref<1x32xf32, #tpu.memory_space<vmem>>, %arg12: memref<1x8x32xbf16, #tpu.memory_space<vmem>>, %arg13: memref<1x4x8x8xbf16, #tpu.memory_space<vmem>>) attributes {dimension_semantics = [#tpu.dimension_semantics<parallel>], iteration_bounds = array<i64: 2>, scalar_prefetch = 0 : i64, scratch_operands = 0 : i64, tpu.core_type = #tpu.core_type<tc>, window_params = [{transform_indices = @transform_0, window_bounds = array<i64: 1, 8, 32>}, {pipeline_mode = #tpu.pipeline_mode<synchronous>, transform_indices = @transform_1, window_bounds = array<i64: 4, 32, 8>}, {pipeline_mode = #tpu.pipeline_mode<synchronous>, transform_indices = @transform_2, window_bounds = array<i64: 4, 32, 8>}, {pipeline_mode = #tpu.pipeline_mode<synchronous>, transform_indices = @transform_3, window_bounds = array<i64: 4, 32, 8>}, {pipeline_mode = #tpu.pipeline_mode<synchronous>, transform_indices = @transform_4, window_bounds = array<i64: 4, 1, 8>}, {pipeline_mode = #tpu.pipeline_mode<synchronous>, transform_indices = @transform_5, window_bounds = array<i64: 4, 1, 8>}, {pipeline_mode = #tpu.pipeline_mode<synchronous>, transform_indices = @transform_6, window_bounds = array<i64: 4, 1, 8>}, {pipeline_mode = #tpu.pipeline_mode<synchronous>, transform_indices = @transform_7, window_bounds = array<i64: 4, 8, 32>}, {pipeline_mode = #tpu.pipeline_mode<synchronous>, transform_indices = @transform_8, window_bounds = array<i64: 1, 32>}, {pipeline_mode = #tpu.pipeline_mode<synchronous>, transform_indices = @transform_9, window_bounds = array<i64: 1, 32>}, {pipeline_mode = #tpu.pipeline_mode<synchronous>, transform_indices = @transform_10, window_bounds = array<i64: 1, 32>}, {transform_indices = @transform_11, window_bounds = array<i64: 1, 8, 32>}, {transform_indices = @transform_12, window_bounds = array<i64: 1, 4, 8, 8>}]} {
    %c0 = arith.constant 0 : index
    %c0_0 = arith.constant 0 : index
    %c0_1 = arith.constant 0 : index
    %0 = vector.load %arg1[%c0, %c0_0, %c0_1] : memref<1x8x32xbf16, #tpu.memory_space<vmem>>, vector<1x8x32xbf16>
    %1 = vector.shape_cast %0 : vector<1x8x32xbf16> to vector<8x32xbf16>
    %cst = arith.constant 0.000000e+00 : f32
    %2 = vector.broadcast %cst : f32 to vector<8x32xf32>
    %c0_2 = arith.constant 0 : index
    %c0_3 = arith.constant 0 : index
    %c0_4 = arith.constant 0 : index
    %3 = vector.load %arg2[%c0_2, %c0_3, %c0_4] : memref<4x32x8xbf16, #tpu.memory_space<vmem>>, vector<1x32x8xbf16>
    %4 = vector.shape_cast %3 : vector<1x32x8xbf16> to vector<32x8xbf16>
    %cst_5 = arith.constant dense<0.000000e+00> : vector<8x8xf32>
    %5 = tpu.matmul %1, %4, %cst_5 {dimension_numbers = #tpu.dot_dimension_numbers<[1], [0], [0], [1], [0, 0, 1, 1], [], []>} : vector<8x32xbf16>, vector<32x8xbf16>, vector<8x8xf32> -> vector<8x8xf32>
    %c0_6 = arith.constant 0 : index
    %c0_7 = arith.constant 0 : index
    %c0_8 = arith.constant 0 : index
    %6 = vector.load %arg5[%c0_6, %c0_7, %c0_8] : memref<4x1x8xf32, #tpu.memory_space<vmem>>, vector<1x1x8xf32>
    %7 = vector.shape_cast %6 : vector<1x1x8xf32> to vector<1x8xf32>
    %8 = vector.broadcast %7 : vector<1x8xf32> to vector<8x8xf32>
    %9 = arith.addf %5, %8 : vector<8x8xf32>
    %c0_9 = arith.constant 0 : index
    %c0_10 = arith.constant 0 : index
    %c0_11 = arith.constant 0 : index
    %10 = vector.load %arg3[%c0_9, %c0_10, %c0_11] : memref<4x32x8xbf16, #tpu.memory_space<vmem>>, vector<1x32x8xbf16>
    %11 = vector.shape_cast %10 : vector<1x32x8xbf16> to vector<32x8xbf16>
    %cst_12 = arith.constant dense<0.000000e+00> : vector<8x8xf32>
    %12 = tpu.matmul %1, %11, %cst_12 {dimension_numbers = #tpu.dot_dimension_numbers<[1], [0], [0], [1], [0, 0, 1, 1], [], []>} : vector<8x32xbf16>, vector<32x8xbf16>, vector<8x8xf32> -> vector<8x8xf32>
    %c0_13 = arith.constant 0 : index
    %c0_14 = arith.constant 0 : index
    %c0_15 = arith.constant 0 : index
    %13 = vector.load %arg6[%c0_13, %c0_14, %c0_15] : memref<4x1x8xf32, #tpu.memory_space<vmem>>, vector<1x1x8xf32>
    %14 = vector.shape_cast %13 : vector<1x1x8xf32> to vector<1x8xf32>
    %15 = vector.broadcast %14 : vector<1x8xf32> to vector<8x8xf32>
    %16 = arith.addf %12, %15 : vector<8x8xf32>
    %c0_16 = arith.constant 0 : index
    %c0_17 = arith.constant 0 : index
    %c0_18 = arith.constant 0 : index
    %17 = vector.load %arg4[%c0_16, %c0_17, %c0_18] : memref<4x32x8xbf16, #tpu.memory_space<vmem>>, vector<1x32x8xbf16>
    %18 = vector.shape_cast %17 : vector<1x32x8xbf16> to vector<32x8xbf16>
    %cst_19 = arith.constant dense<0.000000e+00> : vector<8x8xf32>
    %19 = tpu.matmul %1, %18, %cst_19 {dimension_numbers = #tpu.dot_dimension_numbers<[1], [0], [0], [1], [0, 0, 1, 1], [], []>} : vector<8x32xbf16>, vector<32x8xbf16>, vector<8x8xf32> -> vector<8x8xf32>
    %c0_20 = arith.constant 0 : index
    %c0_21 = arith.constant 0 : index
    %c0_22 = arith.constant 0 : index
    %20 = vector.load %arg7[%c0_20, %c0_21, %c0_22] : memref<4x1x8xf32, #tpu.memory_space<vmem>>, vector<1x1x8xf32>
    %21 = vector.shape_cast %20 : vector<1x1x8xf32> to vector<1x8xf32>
    %22 = vector.broadcast %21 : vector<1x8xf32> to vector<8x8xf32>
    %23 = arith.addf %19, %22 : vector<8x8xf32>
    %24 = arith.truncf %9 : vector<8x8xf32> to vector<8x8xbf16>
    %25 = arith.truncf %16 : vector<8x8xf32> to vector<8x8xbf16>
    "tpu.trace_start"() <{level = 10 : i32, message = "qd,kd->qk"}> : () -> ()
    %cst_23 = arith.constant dense<0.000000e+00> : vector<8x8xf32>
    %26 = tpu.matmul %24, %25, %cst_23 {dimension_numbers = #tpu.dot_dimension_numbers<[1], [1], [0], [0], [0, 0, 1, 0], [], []>} : vector<8x8xbf16>, vector<8x8xbf16>, vector<8x8xf32> -> vector<8x8xf32>
    "tpu.trace_stop"() : () -> ()
    %cst_24 = arith.constant 0.353553385 : f32
    %27 = vector.broadcast %cst_24 : f32 to vector<8x8xf32>
    %28 = arith.mulf %26, %27 : vector<8x8xf32>
    %cst_25 = arith.constant dense<0xFF800000> : vector<8xf32>
    %29 = vector.multi_reduction <maximumf>, %28, %cst_25 [1] : vector<8x8xf32> to vector<8xf32>
    %30 = vector.shape_cast %29 : vector<8xf32> to vector<8x1xf32>
    %31 = vector.broadcast %30 : vector<8x1xf32> to vector<8x8xf32>
    %32 = arith.subf %28, %31 : vector<8x8xf32>
    %33 = math.exp %32 : vector<8x8xf32>
    %cst_26 = arith.constant dense<0.000000e+00> : vector<8xf32>
    %34 = vector.multi_reduction <add>, %33, %cst_26 [1] : vector<8x8xf32> to vector<8xf32>
    %35 = vector.shape_cast %34 : vector<8xf32> to vector<8x1xf32>
    %36 = vector.broadcast %35 : vector<8x1xf32> to vector<8x8xf32>
    %37 = arith.divf %33, %36 : vector<8x8xf32>
    %38 = arith.truncf %37 : vector<8x8xf32> to vector<8x8xbf16>
    %c0_27 = arith.constant 0 : index
    %c0_28 = arith.constant 0 : index
    %c0_29 = arith.constant 0 : index
    %c0_30 = arith.constant 0 : index
    %39 = vector.load %arg13[%c0_27, %c0_28, %c0_29, %c0_30] : memref<1x4x8x8xbf16, #tpu.memory_space<vmem>>, vector<1x1x8x8xbf16>
    %40 = vector.shape_cast %39 : vector<1x1x8x8xbf16> to vector<8x8xbf16>
    %41 = vector.shape_cast %38 : vector<8x8xbf16> to vector<1x1x8x8xbf16>
    tpu.vector_store %arg13[%c0_27, %c0_28, %c0_29, %c0_30], %41 {strides = array<i32>} : memref<1x4x8x8xbf16, #tpu.memory_space<vmem>>, vector<1x1x8x8xbf16>,
    %42 = arith.truncf %37 : vector<8x8xf32> to vector<8x8xbf16>
    %43 = arith.truncf %23 : vector<8x8xf32> to vector<8x8xbf16>
    %cst_31 = arith.constant dense<0.000000e+00> : vector<8x8xf32>
    %44 = tpu.matmul %42, %43, %cst_31 {dimension_numbers = #tpu.dot_dimension_numbers<[1], [0], [0], [1], [0, 0, 1, 1], [], []>} : vector<8x8xbf16>, vector<8x8xbf16>, vector<8x8xf32> -> vector<8x8xf32>
    %45 = arith.truncf %44 : vector<8x8xf32> to vector<8x8xbf16>
    %c0_32 = arith.constant 0 : index
    %c0_33 = arith.constant 0 : index
    %c0_34 = arith.constant 0 : index
    %46 = vector.load %arg8[%c0_32, %c0_33, %c0_34] : memref<4x8x32xbf16, #tpu.memory_space<vmem>>, vector<1x8x32xbf16>
    %47 = vector.shape_cast %46 : vector<1x8x32xbf16> to vector<8x32xbf16>
    %cst_35 = arith.constant dense<0.000000e+00> : vector<8x32xf32>
    %48 = tpu.matmul %45, %47, %cst_35 {dimension_numbers = #tpu.dot_dimension_numbers<[1], [0], [0], [1], [0, 0, 1, 1], [], []>} : vector<8x8xbf16>, vector<8x32xbf16>, vector<8x32xf32> -> vector<8x32xf32>
    %49 = arith.addf %2, %48 : vector<8x32xf32>
    %c1 = arith.constant 1 : index
    %c0_36 = arith.constant 0 : index
    %c0_37 = arith.constant 0 : index
    %50 = vector.load %arg2[%c1, %c0_36, %c0_37] : memref<4x32x8xbf16, #tpu.memory_space<vmem>>, vector<1x32x8xbf16>
    %51 = vector.shape_cast %50 : vector<1x32x8xbf16> to vector<32x8xbf16>
    %cst_38 = arith.constant dense<0.000000e+00> : vector<8x8xf32>
    %52 = tpu.matmul %1, %51, %cst_38 {dimension_numbers = #tpu.dot_dimension_numbers<[1], [0], [0], [1], [0, 0, 1, 1], [], []>} : vector<8x32xbf16>, vector<32x8xbf16>, vector<8x8xf32> -> vector<8x8xf32>
    %c1_39 = arith.constant 1 : index
    %c0_40 = arith.constant 0 : index
    %c0_41 = arith.constant 0 : index
    %53 = vector.load %arg5[%c1_39, %c0_40, %c0_41] : memref<4x1x8xf32, #tpu.memory_space<vmem>>, vector<1x1x8xf32>
    %54 = vector.shape_cast %53 : vector<1x1x8xf32> to vector<1x8xf32>
    %55 = vector.broadcast %54 : vector<1x8xf32> to vector<8x8xf32>
    %56 = arith.addf %52, %55 : vector<8x8xf32>
    %c1_42 = arith.constant 1 : index
    %c0_43 = arith.constant 0 : index
    %c0_44 = arith.constant 0 : index
    %57 = vector.load %arg3[%c1_42, %c0_43, %c0_44] : memref<4x32x8xbf16, #tpu.memory_space<vmem>>, vector<1x32x8xbf16>
    %58 = vector.shape_cast %57 : vector<1x32x8xbf16> to vector<32x8xbf16>
    %cst_45 = arith.constant dense<0.000000e+00> : vector<8x8xf32>
    %59 = tpu.matmul %1, %58, %cst_45 {dimension_numbers = #tpu.dot_dimension_numbers<[1], [0], [0], [1], [0, 0, 1, 1], [], []>} : vector<8x32xbf16>, vector<32x8xbf16>, vector<8x8xf32> -> vector<8x8xf32>
    %c1_46 = arith.constant 1 : index
    %c0_47 = arith.constant 0 : index
    %c0_48 = arith.constant 0 : index
    %60 = vector.load %arg6[%c1_46, %c0_47, %c0_48] : memref<4x1x8xf32, #tpu.memory_space<vmem>>, vector<1x1x8xf32>
    %61 = vector.shape_cast %60 : vector<1x1x8xf32> to vector<1x8xf32>
    %62 = vector.broadcast %61 : vector<1x8xf32> to vector<8x8xf32>
    %63 = arith.addf %59, %62 : vector<8x8xf32>
    %c1_49 = arith.constant 1 : index
    %c0_50 = arith.constant 0 : index
    %c0_51 = arith.constant 0 : index
    %64 = vector.load %arg4[%c1_49, %c0_50, %c0_51] : memref<4x32x8xbf16, #tpu.memory_space<vmem>>, vector<1x32x8xbf16>
    %65 = vector.shape_cast %64 : vector<1x32x8xbf16> to vector<32x8xbf16>
    %cst_52 = arith.constant dense<0.000000e+00> : vector<8x8xf32>
    %66 = tpu.matmul %1, %65, %cst_52 {dimension_numbers = #tpu.dot_dimension_numbers<[1], [0], [0], [1], [0, 0, 1, 1], [], []>} : vector<8x32xbf16>, vector<32x8xbf16>, vector<8x8xf32> -> vector<8x8xf32>
    %c1_53 = arith.constant 1 : index
    %c0_54 = arith.constant 0 : index
    %c0_55 = arith.constant 0 : index
    %67 = vector.load %arg7[%c1_53, %c0_54, %c0_55] : memref<4x1x8xf32, #tpu.memory_space<vmem>>, vector<1x1x8xf32>
    %68 = vector.shape_cast %67 : vector<1x1x8xf32> to vector<1x8xf32>
    %69 = vector.broadcast %68 : vector<1x8xf32> to vector<8x8xf32>
    %70 = arith.addf %66, %69 : vector<8x8xf32>
    %71 = arith.truncf %56 : vector<8x8xf32> to vector<8x8xbf16>
    %72 = arith.truncf %63 : vector<8x8xf32> to vector<8x8xbf16>
    "tpu.trace_start"() <{level = 10 : i32, message = "qd,kd->qk"}> : () -> ()
    %cst_56 = arith.constant dense<0.000000e+00> : vector<8x8xf32>
    %73 = tpu.matmul %71, %72, %cst_56 {dimension_numbers = #tpu.dot_dimension_numbers<[1], [1], [0], [0], [0, 0, 1, 0], [], []>} : vector<8x8xbf16>, vector<8x8xbf16>, vector<8x8xf32> -> vector<8x8xf32>
    "tpu.trace_stop"() : () -> ()
    %cst_57 = arith.constant 0.353553385 : f32
    %74 = vector.broadcast %cst_57 : f32 to vector<8x8xf32>
    %75 = arith.mulf %73, %74 : vector<8x8xf32>
    %cst_58 = arith.constant dense<0xFF800000> : vector<8xf32>
    %76 = vector.multi_reduction <maximumf>, %75, %cst_58 [1] : vector<8x8xf32> to vector<8xf32>
    %77 = vector.shape_cast %76 : vector<8xf32> to vector<8x1xf32>
    %78 = vector.broadcast %77 : vector<8x1xf32> to vector<8x8xf32>
    %79 = arith.subf %75, %78 : vector<8x8xf32>
    %80 = math.exp %79 : vector<8x8xf32>
    %cst_59 = arith.constant dense<0.000000e+00> : vector<8xf32>
    %81 = vector.multi_reduction <add>, %80, %cst_59 [1] : vector<8x8xf32> to vector<8xf32>
    %82 = vector.shape_cast %81 : vector<8xf32> to vector<8x1xf32>
    %83 = vector.broadcast %82 : vector<8x1xf32> to vector<8x8xf32>
    %84 = arith.divf %80, %83 : vector<8x8xf32>
    %85 = arith.truncf %84 : vector<8x8xf32> to vector<8x8xbf16>
    %c0_60 = arith.constant 0 : index
    %c1_61 = arith.constant 1 : index
    %c0_62 = arith.constant 0 : index
    %c0_63 = arith.constant 0 : index
    %86 = vector.load %arg13[%c0_60, %c1_61, %c0_62, %c0_63] : memref<1x4x8x8xbf16, #tpu.memory_space<vmem>>, vector<1x1x8x8xbf16>
    %87 = vector.shape_cast %86 : vector<1x1x8x8xbf16> to vector<8x8xbf16>
    %88 = vector.shape_cast %85 : vector<8x8xbf16> to vector<1x1x8x8xbf16>
    tpu.vector_store %arg13[%c0_60, %c1_61, %c0_62, %c0_63], %88 {strides = array<i32>} : memref<1x4x8x8xbf16, #tpu.memory_space<vmem>>, vector<1x1x8x8xbf16>,
    %89 = arith.truncf %84 : vector<8x8xf32> to vector<8x8xbf16>
    %90 = arith.truncf %70 : vector<8x8xf32> to vector<8x8xbf16>
    %cst_64 = arith.constant dense<0.000000e+00> : vector<8x8xf32>
    %91 = tpu.matmul %89, %90, %cst_64 {dimension_numbers = #tpu.dot_dimension_numbers<[1], [0], [0], [1], [0, 0, 1, 1], [], []>} : vector<8x8xbf16>, vector<8x8xbf16>, vector<8x8xf32> -> vector<8x8xf32>
    %92 = arith.truncf %91 : vector<8x8xf32> to vector<8x8xbf16>
    %c1_65 = arith.constant 1 : index
    %c0_66 = arith.constant 0 : index
    %c0_67 = arith.constant 0 : index
    %93 = vector.load %arg8[%c1_65, %c0_66, %c0_67] : memref<4x8x32xbf16, #tpu.memory_space<vmem>>, vector<1x8x32xbf16>
    %94 = vector.shape_cast %93 : vector<1x8x32xbf16> to vector<8x32xbf16>
    %cst_68 = arith.constant dense<0.000000e+00> : vector<8x32xf32>
    %95 = tpu.matmul %92, %94, %cst_68 {dimension_numbers = #tpu.dot_dimension_numbers<[1], [0], [0], [1], [0, 0, 1, 1], [], []>} : vector<8x8xbf16>, vector<8x32xbf16>, vector<8x32xf32> -> vector<8x32xf32>
    %96 = arith.addf %49, %95 : vector<8x32xf32>
    %c2 = arith.constant 2 : index
    %c0_69 = arith.constant 0 : index
    %c0_70 = arith.constant 0 : index
    %97 = vector.load %arg2[%c2, %c0_69, %c0_70] : memref<4x32x8xbf16, #tpu.memory_space<vmem>>, vector<1x32x8xbf16>
    %98 = vector.shape_cast %97 : vector<1x32x8xbf16> to vector<32x8xbf16>
    %cst_71 = arith.constant dense<0.000000e+00> : vector<8x8xf32>
    %99 = tpu.matmul %1, %98, %cst_71 {dimension_numbers = #tpu.dot_dimension_numbers<[1], [0], [0], [1], [0, 0, 1, 1], [], []>} : vector<8x32xbf16>, vector<32x8xbf16>, vector<8x8xf32> -> vector<8x8xf32>
    %c2_72 = arith.constant 2 : index
    %c0_73 = arith.constant 0 : index
    %c0_74 = arith.constant 0 : index
    %100 = vector.load %arg5[%c2_72, %c0_73, %c0_74] : memref<4x1x8xf32, #tpu.memory_space<vmem>>, vector<1x1x8xf32>
    %101 = vector.shape_cast %100 : vector<1x1x8xf32> to vector<1x8xf32>
    %102 = vector.broadcast %101 : vector<1x8xf32> to vector<8x8xf32>
    %103 = arith.addf %99, %102 : vector<8x8xf32>
    %c2_75 = arith.constant 2 : index
    %c0_76 = arith.constant 0 : index
    %c0_77 = arith.constant 0 : index
    %104 = vector.load %arg3[%c2_75, %c0_76, %c0_77] : memref<4x32x8xbf16, #tpu.memory_space<vmem>>, vector<1x32x8xbf16>
    %105 = vector.shape_cast %104 : vector<1x32x8xbf16> to vector<32x8xbf16>
    %cst_78 = arith.constant dense<0.000000e+00> : vector<8x8xf32>
    %106 = tpu.matmul %1, %105, %cst_78 {dimension_numbers = #tpu.dot_dimension_numbers<[1], [0], [0], [1], [0, 0, 1, 1], [], []>} : vector<8x32xbf16>, vector<32x8xbf16>, vector<8x8xf32> -> vector<8x8xf32>
    %c2_79 = arith.constant 2 : index
    %c0_80 = arith.constant 0 : index
    %c0_81 = arith.constant 0 : index
    %107 = vector.load %arg6[%c2_79, %c0_80, %c0_81] : memref<4x1x8xf32, #tpu.memory_space<vmem>>, vector<1x1x8xf32>
    %108 = vector.shape_cast %107 : vector<1x1x8xf32> to vector<1x8xf32>
    %109 = vector.broadcast %108 : vector<1x8xf32> to vector<8x8xf32>
    %110 = arith.addf %106, %109 : vector<8x8xf32>
    %c2_82 = arith.constant 2 : index
    %c0_83 = arith.constant 0 : index
    %c0_84 = arith.constant 0 : index
    %111 = vector.load %arg4[%c2_82, %c0_83, %c0_84] : memref<4x32x8xbf16, #tpu.memory_space<vmem>>, vector<1x32x8xbf16>
    %112 = vector.shape_cast %111 : vector<1x32x8xbf16> to vector<32x8xbf16>
    %cst_85 = arith.constant dense<0.000000e+00> : vector<8x8xf32>
    %113 = tpu.matmul %1, %112, %cst_85 {dimension_numbers = #tpu.dot_dimension_numbers<[1], [0], [0], [1], [0, 0, 1, 1], [], []>} : vector<8x32xbf16>, vector<32x8xbf16>, vector<8x8xf32> -> vector<8x8xf32>
    %c2_86 = arith.constant 2 : index
    %c0_87 = arith.constant 0 : index
    %c0_88 = arith.constant 0 : index
    %114 = vector.load %arg7[%c2_86, %c0_87, %c0_88] : memref<4x1x8xf32, #tpu.memory_space<vmem>>, vector<1x1x8xf32>
    %115 = vector.shape_cast %114 : vector<1x1x8xf32> to vector<1x8xf32>
    %116 = vector.broadcast %115 : vector<1x8xf32> to vector<8x8xf32>
    %117 = arith.addf %113, %116 : vector<8x8xf32>
    %118 = arith.truncf %103 : vector<8x8xf32> to vector<8x8xbf16>
    %119 = arith.truncf %110 : vector<8x8xf32> to vector<8x8xbf16>
    "tpu.trace_start"() <{level = 10 : i32, message = "qd,kd->qk"}> : () -> ()
    %cst_89 = arith.constant dense<0.000000e+00> : vector<8x8xf32>
    %120 = tpu.matmul %118, %119, %cst_89 {dimension_numbers = #tpu.dot_dimension_numbers<[1], [1], [0], [0], [0, 0, 1, 0], [], []>} : vector<8x8xbf16>, vector<8x8xbf16>, vector<8x8xf32> -> vector<8x8xf32>
    "tpu.trace_stop"() : () -> ()
    %cst_90 = arith.constant 0.353553385 : f32
    %121 = vector.broadcast %cst_90 : f32 to vector<8x8xf32>
    %122 = arith.mulf %120, %121 : vector<8x8xf32>
    %cst_91 = arith.constant dense<0xFF800000> : vector<8xf32>
    %123 = vector.multi_reduction <maximumf>, %122, %cst_91 [1] : vector<8x8xf32> to vector<8xf32>
    %124 = vector.shape_cast %123 : vector<8xf32> to vector<8x1xf32>
    %125 = vector.broadcast %124 : vector<8x1xf32> to vector<8x8xf32>
    %126 = arith.subf %122, %125 : vector<8x8xf32>
    %127 = math.exp %126 : vector<8x8xf32>
    %cst_92 = arith.constant dense<0.000000e+00> : vector<8xf32>
    %128 = vector.multi_reduction <add>, %127, %cst_92 [1] : vector<8x8xf32> to vector<8xf32>
    %129 = vector.shape_cast %128 : vector<8xf32> to vector<8x1xf32>
    %130 = vector.broadcast %129 : vector<8x1xf32> to vector<8x8xf32>
    %131 = arith.divf %127, %130 : vector<8x8xf32>
    %132 = arith.truncf %131 : vector<8x8xf32> to vector<8x8xbf16>
    %c0_93 = arith.constant 0 : index
    %c2_94 = arith.constant 2 : index
    %c0_95 = arith.constant 0 : index
    %c0_96 = arith.constant 0 : index
    %133 = vector.load %arg13[%c0_93, %c2_94, %c0_95, %c0_96] : memref<1x4x8x8xbf16, #tpu.memory_space<vmem>>, vector<1x1x8x8xbf16>
    %134 = vector.shape_cast %133 : vector<1x1x8x8xbf16> to vector<8x8xbf16>
    %135 = vector.shape_cast %132 : vector<8x8xbf16> to vector<1x1x8x8xbf16>
    tpu.vector_store %arg13[%c0_93, %c2_94, %c0_95, %c0_96], %135 {strides = array<i32>} : memref<1x4x8x8xbf16, #tpu.memory_space<vmem>>, vector<1x1x8x8xbf16>,
    %136 = arith.truncf %131 : vector<8x8xf32> to vector<8x8xbf16>
    %137 = arith.truncf %117 : vector<8x8xf32> to vector<8x8xbf16>
    %cst_97 = arith.constant dense<0.000000e+00> : vector<8x8xf32>
    %138 = tpu.matmul %136, %137, %cst_97 {dimension_numbers = #tpu.dot_dimension_numbers<[1], [0], [0], [1], [0, 0, 1, 1], [], []>} : vector<8x8xbf16>, vector<8x8xbf16>, vector<8x8xf32> -> vector<8x8xf32>
    %139 = arith.truncf %138 : vector<8x8xf32> to vector<8x8xbf16>
    %c2_98 = arith.constant 2 : index
    %c0_99 = arith.constant 0 : index
    %c0_100 = arith.constant 0 : index
    %140 = vector.load %arg8[%c2_98, %c0_99, %c0_100] : memref<4x8x32xbf16, #tpu.memory_space<vmem>>, vector<1x8x32xbf16>
    %141 = vector.shape_cast %140 : vector<1x8x32xbf16> to vector<8x32xbf16>
    %cst_101 = arith.constant dense<0.000000e+00> : vector<8x32xf32>
    %142 = tpu.matmul %139, %141, %cst_101 {dimension_numbers = #tpu.dot_dimension_numbers<[1], [0], [0], [1], [0, 0, 1, 1], [], []>} : vector<8x8xbf16>, vector<8x32xbf16>, vector<8x32xf32> -> vector<8x32xf32>
    %143 = arith.addf %96, %142 : vector<8x32xf32>
    %c3 = arith.constant 3 : index
    %c0_102 = arith.constant 0 : index
    %c0_103 = arith.constant 0 : index
    %144 = vector.load %arg2[%c3, %c0_102, %c0_103] : memref<4x32x8xbf16, #tpu.memory_space<vmem>>, vector<1x32x8xbf16>
    %145 = vector.shape_cast %144 : vector<1x32x8xbf16> to vector<32x8xbf16>
    %cst_104 = arith.constant dense<0.000000e+00> : vector<8x8xf32>
    %146 = tpu.matmul %1, %145, %cst_104 {dimension_numbers = #tpu.dot_dimension_numbers<[1], [0], [0], [1], [0, 0, 1, 1], [], []>} : vector<8x32xbf16>, vector<32x8xbf16>, vector<8x8xf32> -> vector<8x8xf32>
    %c3_105 = arith.constant 3 : index
    %c0_106 = arith.constant 0 : index
    %c0_107 = arith.constant 0 : index
    %147 = vector.load %arg5[%c3_105, %c0_106, %c0_107] : memref<4x1x8xf32, #tpu.memory_space<vmem>>, vector<1x1x8xf32>
    %148 = vector.shape_cast %147 : vector<1x1x8xf32> to vector<1x8xf32>
    %149 = vector.broadcast %148 : vector<1x8xf32> to vector<8x8xf32>
    %150 = arith.addf %146, %149 : vector<8x8xf32>
    %c3_108 = arith.constant 3 : index
    %c0_109 = arith.constant 0 : index
    %c0_110 = arith.constant 0 : index
    %151 = vector.load %arg3[%c3_108, %c0_109, %c0_110] : memref<4x32x8xbf16, #tpu.memory_space<vmem>>, vector<1x32x8xbf16>
    %152 = vector.shape_cast %151 : vector<1x32x8xbf16> to vector<32x8xbf16>
    %cst_111 = arith.constant dense<0.000000e+00> : vector<8x8xf32>
    %153 = tpu.matmul %1, %152, %cst_111 {dimension_numbers = #tpu.dot_dimension_numbers<[1], [0], [0], [1], [0, 0, 1, 1], [], []>} : vector<8x32xbf16>, vector<32x8xbf16>, vector<8x8xf32> -> vector<8x8xf32>
    %c3_112 = arith.constant 3 : index
    %c0_113 = arith.constant 0 : index
    %c0_114 = arith.constant 0 : index
    %154 = vector.load %arg6[%c3_112, %c0_113, %c0_114] : memref<4x1x8xf32, #tpu.memory_space<vmem>>, vector<1x1x8xf32>
    %155 = vector.shape_cast %154 : vector<1x1x8xf32> to vector<1x8xf32>
    %156 = vector.broadcast %155 : vector<1x8xf32> to vector<8x8xf32>
    %157 = arith.addf %153, %156 : vector<8x8xf32>
    %c3_115 = arith.constant 3 : index
    %c0_116 = arith.constant 0 : index
    %c0_117 = arith.constant 0 : index
    %158 = vector.load %arg4[%c3_115, %c0_116, %c0_117] : memref<4x32x8xbf16, #tpu.memory_space<vmem>>, vector<1x32x8xbf16>
    %159 = vector.shape_cast %158 : vector<1x32x8xbf16> to vector<32x8xbf16>
    %cst_118 = arith.constant dense<0.000000e+00> : vector<8x8xf32>
    %160 = tpu.matmul %1, %159, %cst_118 {dimension_numbers = #tpu.dot_dimension_numbers<[1], [0], [0], [1], [0, 0, 1, 1], [], []>} : vector<8x32xbf16>, vector<32x8xbf16>, vector<8x8xf32> -> vector<8x8xf32>
    %c3_119 = arith.constant 3 : index
    %c0_120 = arith.constant 0 : index
    %c0_121 = arith.constant 0 : index
    %161 = vector.load %arg7[%c3_119, %c0_120, %c0_121] : memref<4x1x8xf32, #tpu.memory_space<vmem>>, vector<1x1x8xf32>
    %162 = vector.shape_cast %161 : vector<1x1x8xf32> to vector<1x8xf32>
    %163 = vector.broadcast %162 : vector<1x8xf32> to vector<8x8xf32>
    %164 = arith.addf %160, %163 : vector<8x8xf32>
    %165 = arith.truncf %150 : vector<8x8xf32> to vector<8x8xbf16>
    %166 = arith.truncf %157 : vector<8x8xf32> to vector<8x8xbf16>
    "tpu.trace_start"() <{level = 10 : i32, message = "qd,kd->qk"}> : () -> ()
    %cst_122 = arith.constant dense<0.000000e+00> : vector<8x8xf32>
    %167 = tpu.matmul %165, %166, %cst_122 {dimension_numbers = #tpu.dot_dimension_numbers<[1], [1], [0], [0], [0, 0, 1, 0], [], []>} : vector<8x8xbf16>, vector<8x8xbf16>, vector<8x8xf32> -> vector<8x8xf32>
    "tpu.trace_stop"() : () -> ()
    %cst_123 = arith.constant 0.353553385 : f32
    %168 = vector.broadcast %cst_123 : f32 to vector<8x8xf32>
    %169 = arith.mulf %167, %168 : vector<8x8xf32>
    %cst_124 = arith.constant dense<0xFF800000> : vector<8xf32>
    %170 = vector.multi_reduction <maximumf>, %169, %cst_124 [1] : vector<8x8xf32> to vector<8xf32>
    %171 = vector.shape_cast %170 : vector<8xf32> to vector<8x1xf32>
    %172 = vector.broadcast %171 : vector<8x1xf32> to vector<8x8xf32>
    %173 = arith.subf %169, %172 : vector<8x8xf32>
    %174 = math.exp %173 : vector<8x8xf32>
    %cst_125 = arith.constant dense<0.000000e+00> : vector<8xf32>
    %175 = vector.multi_reduction <add>, %174, %cst_125 [1] : vector<8x8xf32> to vector<8xf32>
    %176 = vector.shape_cast %175 : vector<8xf32> to vector<8x1xf32>
    %177 = vector.broadcast %176 : vector<8x1xf32> to vector<8x8xf32>
    %178 = arith.divf %174, %177 : vector<8x8xf32>
    %179 = arith.truncf %178 : vector<8x8xf32> to vector<8x8xbf16>
    %c0_126 = arith.constant 0 : index
    %c3_127 = arith.constant 3 : index
    %c0_128 = arith.constant 0 : index
    %c0_129 = arith.constant 0 : index
    %180 = vector.load %arg13[%c0_126, %c3_127, %c0_128, %c0_129] : memref<1x4x8x8xbf16, #tpu.memory_space<vmem>>, vector<1x1x8x8xbf16>
    %181 = vector.shape_cast %180 : vector<1x1x8x8xbf16> to vector<8x8xbf16>
    %182 = vector.shape_cast %179 : vector<8x8xbf16> to vector<1x1x8x8xbf16>
    tpu.vector_store %arg13[%c0_126, %c3_127, %c0_128, %c0_129], %182 {strides = array<i32>} : memref<1x4x8x8xbf16, #tpu.memory_space<vmem>>, vector<1x1x8x8xbf16>,
    %183 = arith.truncf %178 : vector<8x8xf32> to vector<8x8xbf16>
    %184 = arith.truncf %164 : vector<8x8xf32> to vector<8x8xbf16>
    %cst_130 = arith.constant dense<0.000000e+00> : vector<8x8xf32>
    %185 = tpu.matmul %183, %184, %cst_130 {dimension_numbers = #tpu.dot_dimension_numbers<[1], [0], [0], [1], [0, 0, 1, 1], [], []>} : vector<8x8xbf16>, vector<8x8xbf16>, vector<8x8xf32> -> vector<8x8xf32>
    %186 = arith.truncf %185 : vector<8x8xf32> to vector<8x8xbf16>
    %c3_131 = arith.constant 3 : index
    %c0_132 = arith.constant 0 : index
    %c0_133 = arith.constant 0 : index
    %187 = vector.load %arg8[%c3_131, %c0_132, %c0_133] : memref<4x8x32xbf16, #tpu.memory_space<vmem>>, vector<1x8x32xbf16>
    %188 = vector.shape_cast %187 : vector<1x8x32xbf16> to vector<8x32xbf16>
    %cst_134 = arith.constant dense<0.000000e+00> : vector<8x32xf32>
    %189 = tpu.matmul %186, %188, %cst_134 {dimension_numbers = #tpu.dot_dimension_numbers<[1], [0], [0], [1], [0, 0, 1, 1], [], []>} : vector<8x8xbf16>, vector<8x32xbf16>, vector<8x32xf32> -> vector<8x32xf32>
    %190 = arith.addf %143, %189 : vector<8x32xf32>
    %c0_135 = arith.constant 0 : index
    %c0_136 = arith.constant 0 : index
    %191 = vector.load %arg9[%c0_135, %c0_136] : memref<1x32xf32, #tpu.memory_space<vmem>>, vector<1x32xf32>
    %192 = vector.broadcast %191 : vector<1x32xf32> to vector<8x32xf32>
    %193 = arith.addf %190, %192 : vector<8x32xf32>
    %194 = arith.extf %1 : vector<8x32xbf16> to vector<8x32xf32>
    %195 = arith.addf %193, %194 : vector<8x32xf32>
    %cst_137 = arith.constant dense<0.000000e+00> : vector<8xf32>
    %196 = vector.multi_reduction <add>, %195, %cst_137 [1] : vector<8x32xf32> to vector<8xf32>
    %197 = vector.shape_cast %196 : vector<8xf32> to vector<8x1xf32>
    %cst_138 = arith.constant 3.200000e+01 : f32
    %198 = vector.broadcast %cst_138 : f32 to vector<8x1xf32>
    %199 = arith.divf %197, %198 : vector<8x1xf32>
    %200 = vector.broadcast %199 : vector<8x1xf32> to vector<8x32xf32>
    %201 = arith.subf %195, %200 : vector<8x32xf32>
    %202 = arith.mulf %201, %201 : vector<8x32xf32>
    %cst_139 = arith.constant dense<0.000000e+00> : vector<8xf32>
    %203 = vector.multi_reduction <add>, %202, %cst_139 [1] : vector<8x32xf32> to vector<8xf32>
    %204 = vector.shape_cast %203 : vector<8xf32> to vector<8x1xf32>
    %cst_140 = arith.constant 3.200000e+01 : f32
    %205 = vector.broadcast %cst_140 : f32 to vector<8x1xf32>
    %206 = arith.divf %204, %205 : vector<8x1xf32>
    %207 = vector.broadcast %199 : vector<8x1xf32> to vector<8x32xf32>
    %208 = arith.subf %195, %207 : vector<8x32xf32>
    %cst_141 = arith.constant 9.99999974E-6 : f32
    %209 = vector.broadcast %cst_141 : f32 to vector<8x1xf32>
    %210 = arith.addf %206, %209 : vector<8x1xf32>
    %211 = math.rsqrt %210 : vector<8x1xf32>
    %212 = vector.broadcast %211 : vector<8x1xf32> to vector<8x32xf32>
    %213 = arith.mulf %208, %212 : vector<8x32xf32>
    %c0_142 = arith.constant 0 : index
    %c0_143 = arith.constant 0 : index
    %214 = vector.load %arg10[%c0_142, %c0_143] : memref<1x32xf32, #tpu.memory_space<vmem>>, vector<1x32xf32>
    %215 = vector.broadcast %214 : vector<1x32xf32> to vector<8x32xf32>
    %216 = arith.mulf %213, %215 : vector<8x32xf32>
    %c0_144 = arith.constant 0 : index
    %c0_145 = arith.constant 0 : index
    %217 = vector.load %arg11[%c0_144, %c0_145] : memref<1x32xf32, #tpu.memory_space<vmem>>, vector<1x32xf32>
    %218 = vector.broadcast %217 : vector<1x32xf32> to vector<8x32xf32>
    %219 = arith.addf %216, %218 : vector<8x32xf32>
    %220 = arith.truncf %219 : vector<8x32xf32> to vector<8x32xbf16>
    %c0_146 = arith.constant 0 : index
    %c0_147 = arith.constant 0 : index
    %c0_148 = arith.constant 0 : index
    %221 = vector.load %arg12[%c0_146, %c0_147, %c0_148] : memref<1x8x32xbf16, #tpu.memory_space<vmem>>, vector<1x8x32xbf16>
    %222 = vector.shape_cast %221 : vector<1x8x32xbf16> to vector<8x32xbf16>
    %223 = vector.shape_cast %220 : vector<8x32xbf16> to vector<1x8x32xbf16>
    tpu.vector_store %arg12[%c0_146, %c0_147, %c0_148], %223 {strides = array<i32>} : memref<1x8x32xbf16, #tpu.memory_space<vmem>>, vector<1x8x32xbf16>,
    return
  }
  func.func @transform_0(%arg0: i32) -> (i32, i32, i32) {
    %c0_i32 = arith.constant 0 : i32
    %c0_i32_0 = arith.constant 0 : i32
    %c0_i32_1 = arith.constant 0 : i32
    return %arg0, %c0_i32, %c0_i32_0 : i32, i32, i32
  }
  func.func @transform_1(%arg0: i32) -> (i32, i32, i32) {
    %c0_i32 = arith.constant 0 : i32
    %c0_i32_0 = arith.constant 0 : i32
    %c0_i32_1 = arith.constant 0 : i32
    %c0_i32_2 = arith.constant 0 : i32
    return %c0_i32, %c0_i32_0, %c0_i32_1 : i32, i32, i32
  }
  func.func @transform_2(%arg0: i32) -> (i32, i32, i32) {
    %c0_i32 = arith.constant 0 : i32
    %c0_i32_0 = arith.constant 0 : i32
    %c0_i32_1 = arith.constant 0 : i32
    %c0_i32_2 = arith.constant 0 : i32
    return %c0_i32, %c0_i32_0, %c0_i32_1 : i32, i32, i32
  }
  func.func @transform_3(%arg0: i32) -> (i32, i32, i32) {
    %c0_i32 = arith.constant 0 : i32
    %c0_i32_0 = arith.constant 0 : i32
    %c0_i32_1 = arith.constant 0 : i32
    %c0_i32_2 = arith.constant 0 : i32
    return %c0_i32, %c0_i32_0, %c0_i32_1 : i32, i32, i32
  }
  func.func @transform_4(%arg0: i32) -> (i32, i32, i32) {
    %c0_i32 = arith.constant 0 : i32
    %c0_i32_0 = arith.constant 0 : i32
    %c0_i32_1 = arith.constant 0 : i32
    %c0_i32_2 = arith.constant 0 : i32
    return %c0_i32, %c0_i32_0, %c0_i32_1 : i32, i32, i32
  }
  func.func @transform_5(%arg0: i32) -> (i32, i32, i32) {
    %c0_i32 = arith.constant 0 : i32
    %c0_i32_0 = arith.constant 0 : i32
    %c0_i32_1 = arith.constant 0 : i32
    %c0_i32_2 = arith.constant 0 : i32
    return %c0_i32, %c0_i32_0, %c0_i32_1 : i32, i32, i32
  }
  func.func @transform_6(%arg0: i32) -> (i32, i32, i32) {
    %c0_i32 = arith.constant 0 : i32
    %c0_i32_0 = arith.constant 0 : i32
    %c0_i32_1 = arith.constant 0 : i32
    %c0_i32_2 = arith.constant 0 : i32
    return %c0_i32, %c0_i32_0, %c0_i32_1 : i32, i32, i32
  }
  func.func @transform_7(%arg0: i32) -> (i32, i32, i32) {
    %c0_i32 = arith.constant 0 : i32
    %c0_i32_0 = arith.constant 0 : i32
    %c0_i32_1 = arith.constant 0 : i32
    %c0_i32_2 = arith.constant 0 : i32
    return %c0_i32, %c0_i32_0, %c0_i32_1 : i32, i32, i32
  }
  func.func @transform_8(%arg0: i32) -> (i32, i32) {
    %c0_i32 = arith.constant 0 : i32
    %c0_i32_0 = arith.constant 0 : i32
    %c0_i32_1 = arith.constant 0 : i32
    return %c0_i32, %c0_i32_0 : i32, i32
  }
  func.func @transform_9(%arg0: i32) -> (i32, i32) {
    %c0_i32 = arith.constant 0 : i32
    %c0_i32_0 = arith.constant 0 : i32
    %c0_i32_1 = arith.constant 0 : i32
    return %c0_i32, %c0_i32_0 : i32, i32
  }
  func.func @transform_10(%arg0: i32) -> (i32, i32) {
    %c0_i32 = arith.constant 0 : i32
    %c0_i32_0 = arith.constant 0 : i32
    %c0_i32_1 = arith.constant 0 : i32
    return %c0_i32, %c0_i32_0 : i32, i32
  }
  func.func @transform_11(%arg0: i32) -> (i32, i32, i32) {
    %c0_i32 = arith.constant 0 : i32
    %c0_i32_0 = arith.constant 0 : i32
    %c0_i32_1 = arith.constant 0 : i32
    return %arg0, %c0_i32, %c0_i32_0 : i32, i32, i32
  }
  func.func @transform_12(%arg0: i32) -> (i32, i32, i32, i32) {
    %c0_i32 = arith.constant 0 : i32
    %c0_i32_0 = arith.constant 0 : i32
    %c0_i32_1 = arith.constant 0 : i32
    %c0_i32_2 = arith.constant 0 : i32
    return %arg0, %c0_i32, %c0_i32_0, %c0_i32_1 : i32, i32, i32, i32
  }
}

module attributes {stable_mosaic.version = 11 : i64} {
  func.func @_ffn_ln_kernel(%arg0: i32, %arg1: memref<16x32xbf16, #tpu.memory_space<vmem>>, %arg2: memref<32x64xbf16, #tpu.memory_space<vmem>>, %arg3: memref<1x64xf32, #tpu.memory_space<vmem>>, %arg4: memref<64x32xbf16, #tpu.memory_space<vmem>>, %arg5: memref<1x32xf32, #tpu.memory_space<vmem>>, %arg6: memref<1x32xf32, #tpu.memory_space<vmem>>, %arg7: memref<1x32xf32, #tpu.memory_space<vmem>>, %arg8: memref<16x32xbf16, #tpu.memory_space<vmem>>) attributes {dimension_semantics = [#tpu.dimension_semantics<parallel>], iteration_bounds = array<i64: 1>, scalar_prefetch = 0 : i64, scratch_operands = 0 : i64, tpu.core_type = #tpu.core_type<tc>, window_params = [{transform_indices = @transform_0, window_bounds = array<i64: 16, 32>}, {pipeline_mode = #tpu.pipeline_mode<synchronous>, transform_indices = @transform_1, window_bounds = array<i64: 32, 64>}, {pipeline_mode = #tpu.pipeline_mode<synchronous>, transform_indices = @transform_2, window_bounds = array<i64: 1, 64>}, {pipeline_mode = #tpu.pipeline_mode<synchronous>, transform_indices = @transform_3, window_bounds = array<i64: 64, 32>}, {pipeline_mode = #tpu.pipeline_mode<synchronous>, transform_indices = @transform_4, window_bounds = array<i64: 1, 32>}, {pipeline_mode = #tpu.pipeline_mode<synchronous>, transform_indices = @transform_5, window_bounds = array<i64: 1, 32>}, {pipeline_mode = #tpu.pipeline_mode<synchronous>, transform_indices = @transform_6, window_bounds = array<i64: 1, 32>}, {transform_indices = @transform_7, window_bounds = array<i64: 16, 32>}]} {
    %c0 = arith.constant 0 : index
    %c0_0 = arith.constant 0 : index
    %0 = vector.load %arg1[%c0, %c0_0] : memref<16x32xbf16, #tpu.memory_space<vmem>>, vector<16x32xbf16>
    %c0_1 = arith.constant 0 : index
    %c0_2 = arith.constant 0 : index
    %1 = vector.load %arg2[%c0_1, %c0_2] : memref<32x64xbf16, #tpu.memory_space<vmem>>, vector<32x64xbf16>
    %cst = arith.constant dense<0.000000e+00> : vector<16x64xf32>
    %2 = tpu.matmul %0, %1, %cst {dimension_numbers = #tpu.dot_dimension_numbers<[1], [0], [0], [1], [0, 0, 1, 1], [], []>} : vector<16x32xbf16>, vector<32x64xbf16>, vector<16x64xf32> -> vector<16x64xf32>
    %c0_3 = arith.constant 0 : index
    %c0_4 = arith.constant 0 : index
    %3 = vector.load %arg3[%c0_3, %c0_4] : memref<1x64xf32, #tpu.memory_space<vmem>>, vector<1x64xf32>
    %4 = vector.broadcast %3 : vector<1x64xf32> to vector<16x64xf32>
    %5 = arith.addf %2, %4 : vector<16x64xf32>
    %cst_5 = arith.constant 0.000000e+00 : f32
    %6 = vector.broadcast %cst_5 : f32 to vector<16x64xf32>
    %7 = arith.maximumf %5, %6 : vector<16x64xf32>
    %8 = arith.truncf %7 : vector<16x64xf32> to vector<16x64xbf16>
    %c0_6 = arith.constant 0 : index
    %c0_7 = arith.constant 0 : index
    %9 = vector.load %arg4[%c0_6, %c0_7] : memref<64x32xbf16, #tpu.memory_space<vmem>>, vector<64x32xbf16>
    %cst_8 = arith.constant dense<0.000000e+00> : vector<16x32xf32>
    %10 = tpu.matmul %8, %9, %cst_8 {dimension_numbers = #tpu.dot_dimension_numbers<[1], [0], [0], [1], [0, 0, 1, 1], [], []>} : vector<16x64xbf16>, vector<64x32xbf16>, vector<16x32xf32> -> vector<16x32xf32>
    %c0_9 = arith.constant 0 : index
    %c0_10 = arith.constant 0 : index
    %11 = vector.load %arg5[%c0_9, %c0_10] : memref<1x32xf32, #tpu.memory_space<vmem>>, vector<1x32xf32>
    %12 = vector.broadcast %11 : vector<1x32xf32> to vector<16x32xf32>
    %13 = arith.addf %10, %12 : vector<16x32xf32>
    %14 = arith.extf %0 : vector<16x32xbf16> to vector<16x32xf32>
    %15 = arith.addf %13, %14 : vector<16x32xf32>
    %cst_11 = arith.constant dense<0.000000e+00> : vector<16xf32>
    %16 = vector.multi_reduction <add>, %15, %cst_11 [1] : vector<16x32xf32> to vector<16xf32>
    %17 = vector.shape_cast %16 : vector<16xf32> to vector<16x1xf32>
    %cst_12 = arith.constant 3.200000e+01 : f32
    %18 = vector.broadcast %cst_12 : f32 to vector<16x1xf32>
    %19 = arith.divf %17, %18 : vector<16x1xf32>
    %20 = vector.broadcast %19 : vector<16x1xf32> to vector<16x32xf32>
    %21 = arith.subf %15, %20 : vector<16x32xf32>
    %22 = arith.mulf %21, %21 : vector<16x32xf32>
    %cst_13 = arith.constant dense<0.000000e+00> : vector<16xf32>
    %23 = vector.multi_reduction <add>, %22, %cst_13 [1] : vector<16x32xf32> to vector<16xf32>
    %24 = vector.shape_cast %23 : vector<16xf32> to vector<16x1xf32>
    %cst_14 = arith.constant 3.200000e+01 : f32
    %25 = vector.broadcast %cst_14 : f32 to vector<16x1xf32>
    %26 = arith.divf %24, %25 : vector<16x1xf32>
    %27 = vector.broadcast %19 : vector<16x1xf32> to vector<16x32xf32>
    %28 = arith.subf %15, %27 : vector<16x32xf32>
    %cst_15 = arith.constant 9.99999974E-6 : f32
    %29 = vector.broadcast %cst_15 : f32 to vector<16x1xf32>
    %30 = arith.addf %26, %29 : vector<16x1xf32>
    %31 = math.rsqrt %30 : vector<16x1xf32>
    %32 = vector.broadcast %31 : vector<16x1xf32> to vector<16x32xf32>
    %33 = arith.mulf %28, %32 : vector<16x32xf32>
    %c0_16 = arith.constant 0 : index
    %c0_17 = arith.constant 0 : index
    %34 = vector.load %arg6[%c0_16, %c0_17] : memref<1x32xf32, #tpu.memory_space<vmem>>, vector<1x32xf32>
    %35 = vector.broadcast %34 : vector<1x32xf32> to vector<16x32xf32>
    %36 = arith.mulf %33, %35 : vector<16x32xf32>
    %c0_18 = arith.constant 0 : index
    %c0_19 = arith.constant 0 : index
    %37 = vector.load %arg7[%c0_18, %c0_19] : memref<1x32xf32, #tpu.memory_space<vmem>>, vector<1x32xf32>
    %38 = vector.broadcast %37 : vector<1x32xf32> to vector<16x32xf32>
    %39 = arith.addf %36, %38 : vector<16x32xf32>
    %40 = arith.truncf %39 : vector<16x32xf32> to vector<16x32xbf16>
    %c0_20 = arith.constant 0 : index
    %c0_21 = arith.constant 0 : index
    %41 = vector.load %arg8[%c0_20, %c0_21] : memref<16x32xbf16, #tpu.memory_space<vmem>>, vector<16x32xbf16>
    tpu.vector_store %arg8[%c0_20, %c0_21], %40 {strides = array<i32>} : memref<16x32xbf16, #tpu.memory_space<vmem>>, vector<16x32xbf16>,
    return
  }
  func.func @transform_0(%arg0: i32) -> (i32, i32) {
    %c0_i32 = arith.constant 0 : i32
    %c0_i32_0 = arith.constant 0 : i32
    return %arg0, %c0_i32 : i32, i32
  }
  func.func @transform_1(%arg0: i32) -> (i32, i32) {
    %c0_i32 = arith.constant 0 : i32
    %c0_i32_0 = arith.constant 0 : i32
    %c0_i32_1 = arith.constant 0 : i32
    return %c0_i32, %c0_i32_0 : i32, i32
  }
  func.func @transform_2(%arg0: i32) -> (i32, i32) {
    %c0_i32 = arith.constant 0 : i32
    %c0_i32_0 = arith.constant 0 : i32
    %c0_i32_1 = arith.constant 0 : i32
    return %c0_i32, %c0_i32_0 : i32, i32
  }
  func.func @transform_3(%arg0: i32) -> (i32, i32) {
    %c0_i32 = arith.constant 0 : i32
    %c0_i32_0 = arith.constant 0 : i32
    %c0_i32_1 = arith.constant 0 : i32
    return %c0_i32, %c0_i32_0 : i32, i32
  }
  func.func @transform_4(%arg0: i32) -> (i32, i32) {
    %c0_i32 = arith.constant 0 : i32
    %c0_i32_0 = arith.constant 0 : i32
    %c0_i32_1 = arith.constant 0 : i32
    return %c0_i32, %c0_i32_0 : i32, i32
  }
  func.func @transform_5(%arg0: i32) -> (i32, i32) {
    %c0_i32 = arith.constant 0 : i32
    %c0_i32_0 = arith.constant 0 : i32
    %c0_i32_1 = arith.constant 0 : i32
    return %c0_i32, %c0_i32_0 : i32, i32
  }
  func.func @transform_6(%arg0: i32) -> (i32, i32) {
    %c0_i32 = arith.constant 0 : i32
    %c0_i32_0 = arith.constant 0 : i32
    %c0_i32_1 = arith.constant 0 : i32
    return %c0_i32, %c0_i32_0 : i32, i32
  }
  func.func @transform_7(%arg0: i32) -> (i32, i32) {
    %c0_i32 = arith.constant 0 : i32
    %c0_i32_0 = arith.constant 0 : i32
    return %arg0, %c0_i32 : i32, i32
  }
}

module attributes {stable_mosaic.version = 11 : i64} {
  func.func @_ffn_ln_kernel(%arg0: i32, %arg1: memref<16x32xbf16, #tpu.memory_space<vmem>>, %arg2: memref<32x64xbf16, #tpu.memory_space<vmem>>, %arg3: memref<1x64xf32, #tpu.memory_space<vmem>>, %arg4: memref<64x32xbf16, #tpu.memory_space<vmem>>, %arg5: memref<1x32xf32, #tpu.memory_space<vmem>>, %arg6: memref<1x32xf32, #tpu.memory_space<vmem>>, %arg7: memref<1x32xf32, #tpu.memory_space<vmem>>, %arg8: memref<1x32xf32, #tpu.memory_space<vmem>>, %arg9: memref<1x32xf32, #tpu.memory_space<vmem>>, %arg10: memref<16x32xf32, #tpu.memory_space<vmem>>) attributes {dimension_semantics = [#tpu.dimension_semantics<parallel>], iteration_bounds = array<i64: 1>, scalar_prefetch = 0 : i64, scratch_operands = 0 : i64, tpu.core_type = #tpu.core_type<tc>, window_params = [{transform_indices = @transform_0, window_bounds = array<i64: 16, 32>}, {pipeline_mode = #tpu.pipeline_mode<synchronous>, transform_indices = @transform_1, window_bounds = array<i64: 32, 64>}, {pipeline_mode = #tpu.pipeline_mode<synchronous>, transform_indices = @transform_2, window_bounds = array<i64: 1, 64>}, {pipeline_mode = #tpu.pipeline_mode<synchronous>, transform_indices = @transform_3, window_bounds = array<i64: 64, 32>}, {pipeline_mode = #tpu.pipeline_mode<synchronous>, transform_indices = @transform_4, window_bounds = array<i64: 1, 32>}, {pipeline_mode = #tpu.pipeline_mode<synchronous>, transform_indices = @transform_5, window_bounds = array<i64: 1, 32>}, {pipeline_mode = #tpu.pipeline_mode<synchronous>, transform_indices = @transform_6, window_bounds = array<i64: 1, 32>}, {pipeline_mode = #tpu.pipeline_mode<synchronous>, transform_indices = @transform_7, window_bounds = array<i64: 1, 32>}, {pipeline_mode = #tpu.pipeline_mode<synchronous>, transform_indices = @transform_8, window_bounds = array<i64: 1, 32>}, {transform_indices = @transform_9, window_bounds = array<i64: 16, 32>}]} {
    %c0 = arith.constant 0 : index
    %c0_0 = arith.constant 0 : index
    %0 = vector.load %arg1[%c0, %c0_0] : memref<16x32xbf16, #tpu.memory_space<vmem>>, vector<16x32xbf16>
    %c0_1 = arith.constant 0 : index
    %c0_2 = arith.constant 0 : index
    %1 = vector.load %arg2[%c0_1, %c0_2] : memref<32x64xbf16, #tpu.memory_space<vmem>>, vector<32x64xbf16>
    %cst = arith.constant dense<0.000000e+00> : vector<16x64xf32>
    %2 = tpu.matmul %0, %1, %cst {dimension_numbers = #tpu.dot_dimension_numbers<[1], [0], [0], [1], [0, 0, 1, 1], [], []>} : vector<16x32xbf16>, vector<32x64xbf16>, vector<16x64xf32> -> vector<16x64xf32>
    %c0_3 = arith.constant 0 : index
    %c0_4 = arith.constant 0 : index
    %3 = vector.load %arg3[%c0_3, %c0_4] : memref<1x64xf32, #tpu.memory_space<vmem>>, vector<1x64xf32>
    %4 = vector.broadcast %3 : vector<1x64xf32> to vector<16x64xf32>
    %5 = arith.addf %2, %4 : vector<16x64xf32>
    %cst_5 = arith.constant 0.000000e+00 : f32
    %6 = vector.broadcast %cst_5 : f32 to vector<16x64xf32>
    %7 = arith.maximumf %5, %6 : vector<16x64xf32>
    %8 = arith.truncf %7 : vector<16x64xf32> to vector<16x64xbf16>
    %c0_6 = arith.constant 0 : index
    %c0_7 = arith.constant 0 : index
    %9 = vector.load %arg4[%c0_6, %c0_7] : memref<64x32xbf16, #tpu.memory_space<vmem>>, vector<64x32xbf16>
    %cst_8 = arith.constant dense<0.000000e+00> : vector<16x32xf32>
    %10 = tpu.matmul %8, %9, %cst_8 {dimension_numbers = #tpu.dot_dimension_numbers<[1], [0], [0], [1], [0, 0, 1, 1], [], []>} : vector<16x64xbf16>, vector<64x32xbf16>, vector<16x32xf32> -> vector<16x32xf32>
    %c0_9 = arith.constant 0 : index
    %c0_10 = arith.constant 0 : index
    %11 = vector.load %arg5[%c0_9, %c0_10] : memref<1x32xf32, #tpu.memory_space<vmem>>, vector<1x32xf32>
    %12 = vector.broadcast %11 : vector<1x32xf32> to vector<16x32xf32>
    %13 = arith.addf %10, %12 : vector<16x32xf32>
    %14 = arith.extf %0 : vector<16x32xbf16> to vector<16x32xf32>
    %15 = arith.addf %13, %14 : vector<16x32xf32>
    %cst_11 = arith.constant dense<0.000000e+00> : vector<16xf32>
    %16 = vector.multi_reduction <add>, %15, %cst_11 [1] : vector<16x32xf32> to vector<16xf32>
    %17 = vector.shape_cast %16 : vector<16xf32> to vector<16x1xf32>
    %cst_12 = arith.constant 3.200000e+01 : f32
    %18 = vector.broadcast %cst_12 : f32 to vector<16x1xf32>
    %19 = arith.divf %17, %18 : vector<16x1xf32>
    %20 = vector.broadcast %19 : vector<16x1xf32> to vector<16x32xf32>
    %21 = arith.subf %15, %20 : vector<16x32xf32>
    %22 = arith.mulf %21, %21 : vector<16x32xf32>
    %cst_13 = arith.constant dense<0.000000e+00> : vector<16xf32>
    %23 = vector.multi_reduction <add>, %22, %cst_13 [1] : vector<16x32xf32> to vector<16xf32>
    %24 = vector.shape_cast %23 : vector<16xf32> to vector<16x1xf32>
    %cst_14 = arith.constant 3.200000e+01 : f32
    %25 = vector.broadcast %cst_14 : f32 to vector<16x1xf32>
    %26 = arith.divf %24, %25 : vector<16x1xf32>
    %27 = vector.broadcast %19 : vector<16x1xf32> to vector<16x32xf32>
    %28 = arith.subf %15, %27 : vector<16x32xf32>
    %cst_15 = arith.constant 9.99999974E-6 : f32
    %29 = vector.broadcast %cst_15 : f32 to vector<16x1xf32>
    %30 = arith.addf %26, %29 : vector<16x1xf32>
    %31 = math.rsqrt %30 : vector<16x1xf32>
    %32 = vector.broadcast %31 : vector<16x1xf32> to vector<16x32xf32>
    %33 = arith.mulf %28, %32 : vector<16x32xf32>
    %c0_16 = arith.constant 0 : index
    %c0_17 = arith.constant 0 : index
    %34 = vector.load %arg6[%c0_16, %c0_17] : memref<1x32xf32, #tpu.memory_space<vmem>>, vector<1x32xf32>
    %35 = vector.broadcast %34 : vector<1x32xf32> to vector<16x32xf32>
    %36 = arith.mulf %33, %35 : vector<16x32xf32>
    %c0_18 = arith.constant 0 : index
    %c0_19 = arith.constant 0 : index
    %37 = vector.load %arg7[%c0_18, %c0_19] : memref<1x32xf32, #tpu.memory_space<vmem>>, vector<1x32xf32>
    %38 = vector.broadcast %37 : vector<1x32xf32> to vector<16x32xf32>
    %39 = arith.addf %36, %38 : vector<16x32xf32>
    %cst_20 = arith.constant dense<0.000000e+00> : vector<16xf32>
    %40 = vector.multi_reduction <add>, %39, %cst_20 [1] : vector<16x32xf32> to vector<16xf32>
    %41 = vector.shape_cast %40 : vector<16xf32> to vector<16x1xf32>
    %cst_21 = arith.constant 3.200000e+01 : f32
    %42 = vector.broadcast %cst_21 : f32 to vector<16x1xf32>
    %43 = arith.divf %41, %42 : vector<16x1xf32>
    %44 = vector.broadcast %43 : vector<16x1xf32> to vector<16x32xf32>
    %45 = arith.subf %39, %44 : vector<16x32xf32>
    %46 = arith.mulf %45, %45 : vector<16x32xf32>
    %cst_22 = arith.constant dense<0.000000e+00> : vector<16xf32>
    %47 = vector.multi_reduction <add>, %46, %cst_22 [1] : vector<16x32xf32> to vector<16xf32>
    %48 = vector.shape_cast %47 : vector<16xf32> to vector<16x1xf32>
    %cst_23 = arith.constant 3.200000e+01 : f32
    %49 = vector.broadcast %cst_23 : f32 to vector<16x1xf32>
    %50 = arith.divf %48, %49 : vector<16x1xf32>
    %51 = vector.broadcast %43 : vector<16x1xf32> to vector<16x32xf32>
    %52 = arith.subf %39, %51 : vector<16x32xf32>
    %cst_24 = arith.constant 9.99999997E-7 : f32
    %53 = vector.broadcast %cst_24 : f32 to vector<16x1xf32>
    %54 = arith.addf %50, %53 : vector<16x1xf32>
    %55 = math.rsqrt %54 : vector<16x1xf32>
    %56 = vector.broadcast %55 : vector<16x1xf32> to vector<16x32xf32>
    %57 = arith.mulf %52, %56 : vector<16x32xf32>
    %c0_25 = arith.constant 0 : index
    %c0_26 = arith.constant 0 : index
    %58 = vector.load %arg8[%c0_25, %c0_26] : memref<1x32xf32, #tpu.memory_space<vmem>>, vector<1x32xf32>
    %59 = vector.broadcast %58 : vector<1x32xf32> to vector<16x32xf32>
    %60 = arith.mulf %57, %59 : vector<16x32xf32>
    %c0_27 = arith.constant 0 : index
    %c0_28 = arith.constant 0 : index
    %61 = vector.load %arg9[%c0_27, %c0_28] : memref<1x32xf32, #tpu.memory_space<vmem>>, vector<1x32xf32>
    %62 = vector.broadcast %61 : vector<1x32xf32> to vector<16x32xf32>
    %63 = arith.addf %60, %62 : vector<16x32xf32>
    %c0_29 = arith.constant 0 : index
    %c0_30 = arith.constant 0 : index
    %64 = vector.load %arg10[%c0_29, %c0_30] : memref<16x32xf32, #tpu.memory_space<vmem>>, vector<16x32xf32>
    tpu.vector_store %arg10[%c0_29, %c0_30], %63 {strides = array<i32>} : memref<16x32xf32, #tpu.memory_space<vmem>>, vector<16x32xf32>,
    return
  }
  func.func @transform_0(%arg0: i32) -> (i32, i32) {
    %c0_i32 = arith.constant 0 : i32
    %c0_i32_0 = arith.constant 0 : i32
    return %arg0, %c0_i32 : i32, i32
  }
  func.func @transform_1(%arg0: i32) -> (i32, i32) {
    %c0_i32 = arith.constant 0 : i32
    %c0_i32_0 = arith.constant 0 : i32
    %c0_i32_1 = arith.constant 0 : i32
    return %c0_i32, %c0_i32_0 : i32, i32
  }
  func.func @transform_2(%arg0: i32) -> (i32, i32) {
    %c0_i32 = arith.constant 0 : i32
    %c0_i32_0 = arith.constant 0 : i32
    %c0_i32_1 = arith.constant 0 : i32
    return %c0_i32, %c0_i32_0 : i32, i32
  }
  func.func @transform_3(%arg0: i32) -> (i32, i32) {
    %c0_i32 = arith.constant 0 : i32
    %c0_i32_0 = arith.constant 0 : i32
    %c0_i32_1 = arith.constant 0 : i32
    return %c0_i32, %c0_i32_0 : i32, i32
  }
  func.func @transform_4(%arg0: i32) -> (i32, i32) {
    %c0_i32 = arith.constant 0 : i32
    %c0_i32_0 = arith.constant 0 : i32
    %c0_i32_1 = arith.constant 0 : i32
    return %c0_i32, %c0_i32_0 : i32, i32
  }
  func.func @transform_5(%arg0: i32) -> (i32, i32) {
    %c0_i32 = arith.constant 0 : i32
    %c0_i32_0 = arith.constant 0 : i32
    %c0_i32_1 = arith.constant 0 : i32
    return %c0_i32, %c0_i32_0 : i32, i32
  }
  func.func @transform_6(%arg0: i32) -> (i32, i32) {
    %c0_i32 = arith.constant 0 : i32
    %c0_i32_0 = arith.constant 0 : i32
    %c0_i32_1 = arith.constant 0 : i32
    return %c0_i32, %c0_i32_0 : i32, i32
  }
  func.func @transform_7(%arg0: i32) -> (i32, i32) {
    %c0_i32 = arith.constant 0 : i32
    %c0_i32_0 = arith.constant 0 : i32
    %c0_i32_1 = arith.constant 0 : i32
    return %c0_i32, %c0_i32_0 : i32, i32
  }
  func.func @transform_8(%arg0: i32) -> (i32, i32) {
    %c0_i32 = arith.constant 0 : i32
    %c0_i32_0 = arith.constant 0 : i32
    %c0_i32_1 = arith.constant 0 : i32
    return %c0_i32, %c0_i32_0 : i32, i32
  }
  func.func @transform_9(%arg0: i32) -> (i32, i32) {
    %c0_i32 = arith.constant 0 : i32
    %c0_i32_0 = arith.constant 0 : i32
    return %arg0, %c0_i32 : i32, i32
  }
}

</mosaic_0001>

<bundles_post_ra>
// kernel: transformer_encoder.7
= control target key start
LH: loop header
LB: loop body
LE: loop exit
PB: predicated region body
PF: predicated region fallthrough
CT: control target
= control target key end

     0   :  { %v393_v1 = vmov 0.0   ;;  %vm394_vm0 = vmmov 0   ;;  %s501_s0 = inlined_call_operand.vmem [shape: bf16[16,32], index: 0, kind: input, shape index: {}]   ;;  %s502_s1 = inlined_call_operand.vmem [shape: bf16[32,64], index: 1, kind: input, shape index: {}]   ;;  %s503_s2 = inlined_call_operand.vmem [shape: f32[1,64], index: 2, kind: input, shape index: {}]   ;;  %s504_s3 = inlined_call_operand.vmem [shape: bf16[64,32], index: 3, kind: input, shape index: {}]   ;;  %s505_s4 = inlined_call_operand.vmem [shape: f32[1,32], index: 4, kind: input, shape index: {}]   ;;  %s506_s5 = inlined_call_operand.vmem [shape: f32[1,32], index: 5, kind: input, shape index: {}]   ;;  %s507_s6 = inlined_call_operand.vmem [shape: f32[1,32], index: 6, kind: input, shape index: {}]   ;;  %s508_s7 = inlined_call_operand.vmem [shape: f32[1,32], index: 7, kind: input, shape index: {}]   ;;  %s509_s8 = inlined_call_operand.vmem [shape: f32[1,32], index: 8, kind: input, shape index: {}]   ;;  %s510_s9 = inlined_call_operand.hbm [shape: f32[16,32], index: 9, kind: output, shape index: {}]  }
   0x1   :  { %v355_v0 = vld [vmem:[%s502_s1 + $0x8] sm:$0xff]   ;;  %330 = vmatprep.subr.bf16.mxu0 %v393_v1  ;;  %v356_v2 = vld [vmem:[%s502_s1] sm:$0xff]   ;;  %338 = vmatprep.subr.bf16.mxu1 %v393_v1  ;;  %v358_v4 = vld [vmem:[%s504_s3 + $0x18] sm:$0xff]  }
   0x2   :  { %331 = vmatpush3.bf16.msra.mxu0 %v355_v0  ;;  %334 = vmatprep.mubr.msk.bf16.mxu0 %vm394_vm0, %v393_v1  ;;  %v34_v3 = vld [vmem:[%s501_s0] sm:$0xff]  }
   0x3   :  { %332 = vmatprep.subr.bf16.mxu0 %v393_v1  ;;  %346 = vmatprep.mubr.msk.bf16.mxu1 %vm394_vm0, %v393_v1 }
   0x4   :  { %339 = vmatpush3.bf16.msra.mxu1 %v358_v4 }
   0x5   :  { %14 = vsyncpa [#allocation3], 0  ;;  %vm64_vm1 = vcmask 261120   ;;  %340 = vmatprep.subr.bf16.mxu1 %v393_v1  ;;  %v359_v5 = vld [vmem:[%s504_s3 + $0x10] sm:$0xff]   ;;  %v360_v6 = vld [vmem:[%s504_s3 + $0x8] sm:$0xff]   ;;  %vm151_vm2 = vcmask 523264   ;;  %v196_v19 = vunpack.c.l.bf16 %v34_v3  ;;  %v197_v24 = vunpack.c.h.bf16 %v34_v3 }
   0x6   :  { %333 = vmatpush3.bf16.msra.mxu0 %v356_v2  ;;  %v361_v7 = vld [vmem:[%s504_s3] sm:$0xff]   ;;  %s395_s28 = smov [#allocation2]  }
   0x7   :  { %v307_v8 = vld [vmem:[%s503_s2] ss:$0 sm:$0xff]  ;;  %s296_s29 = sshll.u32 %s395_s28, 4  ;;  %s297_s29 = int_to_ptr.vmem [resolvable:$true] %s296_s29 }
   0x8   :  { %341 = vmatpush3.bf16.msra.mxu1 %v359_v5  ;;  %v312_v18 = vld [vmem:[%s505_s4] ss:$0 sm:$0xff]  ;;  %s371_s30 = scalar_lea.vmem %s297_s29, 256  ;;  %p376_p1 = scmp.lt.s32.totalorder %s297_s29, %s297_s29 }
   0x9   :  { %335 = vmatmul.mubr.msk.bf16.vlgmr.msra.gmra.mxu0 %vm64_vm1, %v34_v3  ;;  %342 = vmatprep.subr.bf16.mxu1 %v393_v1  ;;  %v318_v48 = vld [vmem:[%s506_s5] ss:$0 sm:$0xff]  ;;  %p372_p0 = scmp.ne.s32.totalorder %s297_s29, %s371_s30  ;;  %p377_p2 = scmp.lt.s32.totalorder %s371_s30, %s371_s30 }
   0xa   :  { %v319_v50 = vld [vmem:[%s507_s6] ss:$0 sm:$0xff] }
   0xb   :  { %p378_p3 = por %p377_p2, %p376_p1 }
   0xc   :  { %343 = vmatpush3.bf16.msra.mxu1 %v360_v6 }
   0xd   :  { %344 = vmatprep.subr.bf16.mxu1 %v393_v1  ;;  %p379_p4 = pnand %p378_p3, %p372_p0 }
  0x10   :  { %345 = vmatpush3.bf16.msra.mxu1 %v361_v7 }
  0xc9   :  { %v102_v9 = vpop.f32.mrf.mxu0 }
  0xca   :  { %v103_v11 = vadd.f32 %v307_v8, %v102_v9 }
  0xcb   :  { %v336_v10 = vpop.f32.mrf.mxu0 }
  0xcc   :  { %v109_v15 = vmax.f32 %v103_v11, 0.0 }
  0xcd   :  { %v105_v12 = vpop.f32.mrf.mxu0 }
  0xce   :  { %v106_v13 = vadd.f32 %v307_v8, %v105_v12  ;;  %v320_v12 = vld [vmem:[%s508_s7] ss:$0 sm:$0xff] }
  0xcf   :  { %v337_v14 = vpop.f32.mrf.mxu0 }
  0xd0   :  { %v110_v16 = vmax.f32 %v106_v13, 0.0  ;;  %v321_v14 = vld [vmem:[%s509_s8] ss:$0 sm:$0xff] }
  0xd2   :  { %v111_v17 = vpack.c.bf16 %v110_v16, %v109_v15 }
  0xd4   :  { %347 = vmatmul.mubr.msk.bf16.vlgmr.msra.gmra.mxu1 %vm151_vm2, %v111_v17 }
 0x194   :  { %v189_v20 = vpop.f32.mrf.mxu1 }
 0x195   :  { %v190_v21 = vadd.f32 %v312_v18, %v189_v20 }
 0x196   :  { %v348_v22 = vpop.f32.mrf.mxu1 }
 0x197   :  { %v198_v23 = vadd.f32 %v196_v19, %v190_v21 }
 0x198   :  { %v192_v25 = vpop.f32.mrf.mxu1 }
 0x199   :  { %v193_v26 = vadd.f32 %v312_v18, %v192_v25  ;;  %v200_v27 = vsel %vm64_vm1, %v198_v23, 0.0 }
 0x19a   :  { %201 = vadd.xlane.f32.xlu0 %v200_v27  ;;  %v349_v28 = vpop.f32.mrf.mxu1 }
 0x19b   :  { %v199_v29 = vadd.f32 %v197_v24, %v193_v26 }
 0x19d   :  { %v203_v30 = vsel %vm64_vm1, %v199_v29, 0.0 }
 0x19e   :  { %204 = vadd.xlane.f32.xlu0 %v203_v30 }
 0x223   :  { %v202_v31 = vpop.xlane.xlu0 %201 }
 0x224   :  { %v207_v32 = vmul.f32 0.03125, %v202_v31 }
 0x226   :  { %v209_v33 = vsub.f32 %v198_v23, %v207_v32 }
 0x227   :  { %v205_v34 = vpop.xlane.xlu0 %204 }
 0x228   :  { %v208_v35 = vmul.f32 0.03125, %v205_v34  ;;  %v211_v36 = vmul.f32 %v209_v33, %v209_v33 }
 0x22a   :  { %v210_v37 = vsub.f32 %v199_v29, %v208_v35  ;;  %v213_v38 = vsel %vm64_vm1, %v211_v36, 0.0 }
 0x22b   :  { %214 = vadd.xlane.f32.xlu1 %v213_v38 }
 0x22c   :  { %v212_v39 = vmul.f32 %v210_v37, %v210_v37 }
 0x22e   :  { %v216_v40 = vsel %vm64_vm1, %v212_v39, 0.0 }
 0x22f   :  { %217 = vadd.xlane.f32.xlu1 %v216_v40 }
 0x2b4   :  { %v215_v41 = vpop.xlane.xlu1 %214 }
 0x2b5   :  { %v219_v42 = vmul.f32 0.03125, %v215_v41 }
 0x2b7   :  { %v221_v43 = vadd.f32 1e-05, %v219_v42 }
 0x2b8   :  { %v218_v44 = vpop.xlane.xlu1 %217 }
 0x2b9   :  { %363 = vrsqrt.f32 %v221_v43  ;;  %v220_v45 = vmul.f32 0.03125, %v218_v44 }
 0x2bb   :  { %v222_v46 = vadd.f32 1e-05, %v220_v45 }
 0x2bd   :  { %365 = vrsqrt.f32 %v222_v46 }
 0x2c6   :  { %v364_v47 = vpop.eup %363 }
 0x2c7   :  { %v225_v49 = vmul.f32 %v364_v47, %v209_v33 }
 0x2c9   :  { %v234_v51 = vmul.f32 %v318_v48, %v225_v49 }
 0x2ca   :  { %v366_v52 = vpop.eup %365 }
 0x2cb   :  { %v243_v53 = vadd.f32 %v319_v50, %v234_v51  ;;  %v226_v54 = vmul.f32 %v366_v52, %v210_v37 }
 0x2cd   :  { %v245_v55 = vsel %vm64_vm1, %v243_v53, 0.0  ;;  %v235_v56 = vmul.f32 %v318_v48, %v226_v54 }
 0x2ce   :  { %246 = vadd.xlane.f32.xlu0 %v245_v55 }
 0x2cf   :  { %v244_v57 = vadd.f32 %v319_v50, %v235_v56 }
 0x2d1   :  { %v248_v58 = vsel %vm64_vm1, %v244_v57, 0.0 }
 0x2d2   :  { %249 = vadd.xlane.f32.xlu1 %v248_v58 }
 0x357   :  { %v247_v59 = vpop.xlane.xlu0 %246 }
 0x358   :  { %v251_v60 = vmul.f32 0.03125, %v247_v59 }
 0x35a   :  { %v253_v61 = vsub.f32 %v243_v53, %v251_v60 }
 0x35b   :  { %v250_v62 = vpop.xlane.xlu1 %249 }
 0x35c   :  { %v252_v63 = vmul.f32 0.03125, %v250_v62  ;;  %v255_v0 = vmul.f32 %v253_v61, %v253_v61 }
 0x35e   :  { %v254_v1 = vsub.f32 %v244_v57, %v252_v63  ;;  %v257_v2 = vsel %vm64_vm1, %v255_v0, 0.0 }
 0x35f   :  { %258 = vadd.xlane.f32.xlu0 %v257_v2 }
 0x360   :  { %v256_v3 = vmul.f32 %v254_v1, %v254_v1 }
 0x362   :  { %v260_v4 = vsel %vm64_vm1, %v256_v3, 0.0 }
 0x363   :  { %261 = vadd.xlane.f32.xlu1 %v260_v4 }
 0x3e8   :  { %v259_v5 = vpop.xlane.xlu0 %258 }
 0x3e9   :  { %v263_v6 = vmul.f32 0.03125, %v259_v5 }
 0x3eb   :  { %v265_v7 = vadd.f32 1e-06, %v263_v6 }
 0x3ec   :  { %v262_v8 = vpop.xlane.xlu1 %261 }
 0x3ed   :  { %367 = vrsqrt.f32 %v265_v7  ;;  %v264_v9 = vmul.f32 0.03125, %v262_v8 }
 0x3ef   :  { %v266_v10 = vadd.f32 1e-06, %v264_v9 }
 0x3f1   :  { %369 = vrsqrt.f32 %v266_v10 }
 0x3fa   :  { %v368_v11 = vpop.eup %367 }
 0x3fb   :  { %v269_v13 = vmul.f32 %v368_v11, %v253_v61 }
 0x3fd   :  { %v278_v15 = vmul.f32 %v320_v12, %v269_v13 }
 0x3fe   :  { %v370_v16 = vpop.eup %369 }
 0x3ff   :  { %v270_v17 = vmul.f32 %v370_v16, %v254_v1  ;;  %v287_v18 = vadd.f32 %v321_v14, %v278_v15 }
 0x401   :  { %v279_v19 = vmul.f32 %v320_v12, %v270_v17  ;;  %289 = vst.msk [vmem:[#allocation2] sm:$0xff] %vm64_vm1, %v287_v18 }
 0x403   :  { %v288_v20 = vadd.f32 %v321_v14, %v279_v19 }
 0x405   :  { %290 = vst.msk [vmem:[#allocation2 + $0x8] sm:$0xff] %vm64_vm1, %v288_v20 }
 0x406   :  { %382 = shalt.err (!%p379_p4)
}
 0x407   :  { %s396_s7 = smov 128   ;;  %s397_s8 = smov 8  }
 0x408   :  { %302 = dma.vmem_to_hbm [thread:$0]  %s297_s29, 256, %s510_s9, [#allocation3], %s396_s7, %s396_s7, %s397_s8  }
 0x409   :  { %391 = dma.done.wait [#allocation3], 256  }
 0x40a   :  { %392 = vsyncadd [#allocation3], 4294967040 }
 0x40b   :  { %306 = vsyncpa [#allocation3], 1 }

// kernel: transformer_encoder.5
= control target key start
LH: loop header
LB: loop body
LE: loop exit
PB: predicated region body
PF: predicated region fallthrough
CT: control target
= control target key end

     0   :  { %v312_v0 = vmov 0.0   ;;  %vm313_vm0 = vmmov 0   ;;  %vm57_vm1 = vcmask 261120   ;;  %vm144_vm2 = vcmask 523264   ;;  %s398_s1 = inlined_call_operand.vmem [shape: bf16[32,64], index: 1, kind: input, shape index: {}]   ;;  %s399_s0 = inlined_call_operand.vmem [shape: bf16[16,32], index: 0, kind: input, shape index: {}]   ;;  %s400_s3 = inlined_call_operand.vmem [shape: bf16[64,32], index: 3, kind: input, shape index: {}]   ;;  %s401_s2 = inlined_call_operand.vmem [shape: f32[1,64], index: 2, kind: input, shape index: {}]   ;;  %s402_s4 = inlined_call_operand.vmem [shape: f32[1,32], index: 4, kind: input, shape index: {}]   ;;  %s403_s5 = inlined_call_operand.vmem [shape: f32[1,32], index: 5, kind: input, shape index: {}]   ;;  %s404_s6 = inlined_call_operand.vmem [shape: f32[1,32], index: 6, kind: input, shape index: {}]   ;;  %s405_s7 = inlined_call_operand.vmem [shape: bf16[16,32], index: 7, kind: output, shape index: {}]  }
   0x1   :  { %278 = vmatprep.subr.bf16.mxu0 %v312_v0  ;;  %v300_v1 = vld [vmem:[%s398_s1 + $0x8] sm:$0xff]   ;;  %282 = vmatprep.mubr.msk.bf16.mxu0 %vm313_vm0, %v312_v0  ;;  %v301_v2 = vld [vmem:[%s398_s1] sm:$0xff]   ;;  %v303_v4 = vld [vmem:[%s400_s3 + $0x18] sm:$0xff]   ;;  %vm246_vm3 = vcmask 257024  }
   0x2   :  { %286 = vmatprep.subr.bf16.mxu1 %v312_v0  ;;  %294 = vmatprep.mubr.msk.bf16.mxu1 %vm313_vm0, %v312_v0  ;;  %v27_v3 = vld [vmem:[%s399_s0] sm:$0xff]   ;;  %v304_v5 = vld [vmem:[%s400_s3 + $0x10] sm:$0xff]   ;;  %v305_v6 = vld [vmem:[%s400_s3 + $0x8] sm:$0xff]  }
   0x3   :  { %279 = vmatpush3.bf16.msra.mxu0 %v300_v1  ;;  %287 = vmatpush3.bf16.msra.mxu1 %v303_v4  ;;  %v306_v7 = vld [vmem:[%s400_s3] sm:$0xff]   ;;  %v189_v19 = vunpack.c.l.bf16 %v27_v3  ;;  %v190_v24 = vunpack.c.h.bf16 %v27_v3 }
   0x4   :  { %280 = vmatprep.subr.bf16.mxu0 %v312_v0  ;;  %288 = vmatprep.subr.bf16.mxu1 %v312_v0  ;;  %v253_v8 = vld [vmem:[%s401_s2] ss:$0 sm:$0xff] }
   0x5   :  { %v258_v18 = vld [vmem:[%s402_s4] ss:$0 sm:$0xff] }
   0x6   :  { %v264_v48 = vld [vmem:[%s403_s5] ss:$0 sm:$0xff] }
   0x7   :  { %281 = vmatpush3.bf16.msra.mxu0 %v301_v2  ;;  %289 = vmatpush3.bf16.msra.mxu1 %v304_v5  ;;  %v265_v50 = vld [vmem:[%s404_s6] ss:$0 sm:$0xff] }
   0x8   :  { %290 = vmatprep.subr.bf16.mxu1 %v312_v0 }
   0xa   :  { %283 = vmatmul.mubr.msk.bf16.vlgmr.msra.gmra.mxu0 %vm57_vm1, %v27_v3 }
   0xb   :  { %291 = vmatpush3.bf16.msra.mxu1 %v305_v6 }
   0xc   :  { %292 = vmatprep.subr.bf16.mxu1 %v312_v0 }
   0xf   :  { %293 = vmatpush3.bf16.msra.mxu1 %v306_v7 }
  0xca   :  { %v95_v9 = vpop.f32.mrf.mxu0 }
  0xcb   :  { %v96_v11 = vadd.f32 %v253_v8, %v95_v9 }
  0xcc   :  { %v284_v10 = vpop.f32.mrf.mxu0 }
  0xcd   :  { %v102_v15 = vmax.f32 %v96_v11, 0.0 }
  0xce   :  { %v98_v12 = vpop.f32.mrf.mxu0 }
  0xcf   :  { %v99_v13 = vadd.f32 %v253_v8, %v98_v12 }
  0xd0   :  { %v285_v14 = vpop.f32.mrf.mxu0 }
  0xd1   :  { %v103_v16 = vmax.f32 %v99_v13, 0.0 }
  0xd3   :  { %v104_v17 = vpack.c.bf16 %v103_v16, %v102_v15 }
  0xd5   :  { %295 = vmatmul.mubr.msk.bf16.vlgmr.msra.gmra.mxu1 %vm144_vm2, %v104_v17 }
 0x195   :  { %v182_v20 = vpop.f32.mrf.mxu1 }
 0x196   :  { %v183_v21 = vadd.f32 %v258_v18, %v182_v20 }
 0x197   :  { %v296_v22 = vpop.f32.mrf.mxu1 }
 0x198   :  { %v191_v23 = vadd.f32 %v189_v19, %v183_v21 }
 0x199   :  { %v185_v25 = vpop.f32.mrf.mxu1 }
 0x19a   :  { %v186_v26 = vadd.f32 %v258_v18, %v185_v25  ;;  %v193_v27 = vsel %vm57_vm1, %v191_v23, 0.0 }
 0x19b   :  { %194 = vadd.xlane.f32.xlu0 %v193_v27  ;;  %v297_v28 = vpop.f32.mrf.mxu1 }
 0x19c   :  { %v192_v29 = vadd.f32 %v190_v24, %v186_v26 }
 0x19e   :  { %v196_v30 = vsel %vm57_vm1, %v192_v29, 0.0 }
 0x19f   :  { %197 = vadd.xlane.f32.xlu0 %v196_v30 }
 0x224   :  { %v195_v31 = vpop.xlane.xlu0 %194 }
 0x225   :  { %v200_v32 = vmul.f32 0.03125, %v195_v31 }
 0x227   :  { %v202_v33 = vsub.f32 %v191_v23, %v200_v32 }
 0x228   :  { %v198_v34 = vpop.xlane.xlu0 %197 }
 0x229   :  { %v201_v35 = vmul.f32 0.03125, %v198_v34  ;;  %v204_v36 = vmul.f32 %v202_v33, %v202_v33 }
 0x22b   :  { %v203_v37 = vsub.f32 %v192_v29, %v201_v35  ;;  %v206_v38 = vsel %vm57_vm1, %v204_v36, 0.0 }
 0x22c   :  { %207 = vadd.xlane.f32.xlu1 %v206_v38 }
 0x22d   :  { %v205_v39 = vmul.f32 %v203_v37, %v203_v37 }
 0x22f   :  { %v209_v40 = vsel %vm57_vm1, %v205_v39, 0.0 }
 0x230   :  { %210 = vadd.xlane.f32.xlu1 %v209_v40 }
 0x2b5   :  { %v208_v41 = vpop.xlane.xlu1 %207 }
 0x2b6   :  { %v212_v42 = vmul.f32 0.03125, %v208_v41 }
 0x2b8   :  { %v214_v43 = vadd.f32 1e-05, %v212_v42 }
 0x2b9   :  { %v211_v44 = vpop.xlane.xlu1 %210 }
 0x2ba   :  { %308 = vrsqrt.f32 %v214_v43  ;;  %v213_v45 = vmul.f32 0.03125, %v211_v44 }
 0x2bc   :  { %v215_v46 = vadd.f32 1e-05, %v213_v45 }
 0x2be   :  { %310 = vrsqrt.f32 %v215_v46 }
 0x2c7   :  { %v309_v47 = vpop.eup %308 }
 0x2c8   :  { %v218_v49 = vmul.f32 %v309_v47, %v202_v33 }
 0x2ca   :  { %v227_v51 = vmul.f32 %v264_v48, %v218_v49 }
 0x2cb   :  { %v311_v52 = vpop.eup %310 }
 0x2cc   :  { %v236_v53 = vadd.f32 %v265_v50, %v227_v51  ;;  %v219_v54 = vmul.f32 %v311_v52, %v203_v37 }
 0x2ce   :  { %v268_v55 = vpack.c.bf16 %v236_v53, %v236_v53  ;;  %v228_v56 = vmul.f32 %v264_v48, %v219_v54 }
 0x2d0   :  { %247 = vst.msk [vmem:[%s405_s7] sm:$0xf] %vm246_vm3, %v268_v55  ;;  %v237_v57 = vadd.f32 %v265_v50, %v228_v56 }
 0x2d2   :  { %v269_v58 = vpack.c.bf16 %v237_v57, %v237_v57 }
 0x2d4   :  { %248 = vst.msk [vmem:[%s405_s7 + $0x4] sm:$0xf] %vm246_vm3, %v269_v58 }

// kernel: transformer_encoder.4
= control target key start
LH: loop header
LB: loop body
LE: loop exit
PB: predicated region body
PF: predicated region fallthrough
CT: control target
= control target key end

     0   :  { %s2451_s21 = smov 0   ;;  %s2776_s0 = inlined_call_operand.vmem [shape: bf16[2,8,32], index: 0, kind: input, shape index: {}]   ;;  %s2777_s1 = inlined_call_operand.vmem [shape: bf16[4,32,8], index: 1, kind: input, shape index: {}]   ;;  %s2778_s2 = inlined_call_operand.vmem [shape: bf16[4,32,8], index: 2, kind: input, shape index: {}]   ;;  %s2779_s3 = inlined_call_operand.vmem [shape: bf16[4,32,8], index: 3, kind: input, shape index: {}]   ;;  %s2780_s4 = inlined_call_operand.vmem [shape: f32[4,1,8], index: 4, kind: input, shape index: {}]   ;;  %s2781_s5 = inlined_call_operand.vmem [shape: f32[4,1,8], index: 5, kind: input, shape index: {}]   ;;  %s2782_s6 = inlined_call_operand.vmem [shape: f32[4,1,8], index: 6, kind: input, shape index: {}]   ;;  %s2783_s7 = inlined_call_operand.vmem [shape: bf16[4,8,32], index: 7, kind: input, shape index: {}]   ;;  %s2784_s8 = inlined_call_operand.vmem [shape: f32[1,32], index: 8, kind: input, shape index: {}]   ;;  %s2785_s9 = inlined_call_operand.vmem [shape: f32[1,32], index: 9, kind: input, shape index: {}]   ;;  %s2786_s10 = inlined_call_operand.vmem [shape: f32[1,32], index: 10, kind: input, shape index: {}]   ;;  %s2787_s11 = inlined_call_operand.vmem [shape: bf16[2,8,32], index: 11, kind: output, shape index: {0}]   ;;  %s2788_s12 = inlined_call_operand.vmem [shape: bf16[2,4,8,8], index: 12, kind: output, shape index: {1}]  }
   0x1 LB: > { %s1970_s22 = sadd.s32 4294967295, %s2382_s21   ;;  %p1974_p0 = scmp.ge.s32.totalorder %s2382_s21, 1  ;;  %s2382_s21 = sphi %s2451_s21, %s23_s21  }
   0x2   : > { %p364_p1 = scmp.lt.s32.totalorder %s2382_s21, 3 }
   0x4   : > { %p365_p2 = pnand %p1974_p0, %p364_p1 }
   0x5   : > { %p409_p3 = scmp.lt.s32.totalorder (!%p365_p2), %s1970_s22, 1 }
   0x6   : > { %368 = sbr.rel (%p365_p2) target bundleno = 3987 (0xf93), region = 64 }
   0xb   : > { %v2334_v0 = vld [vmem:[%s2778_s2 + $0x8] sm:$0xff]   ;;  %v2384_v1 = vmov 0.0   ;;  %v2336_v3 = vld [vmem:[%s2778_s2] sm:$0xff]   ;;  %vm2385_vm0 = vmmov 0   ;;  %s2790_s22 = smov (!%p409_p3, %s1970_s22), 1  ;;  %vm447_vm1 = vcmask 261120  }
   0xc   : > { %2164 = vmatprep.subr.bf16.mxu1 %v2384_v1  ;;  %2156 = vmatprep.subr.bf16.mxu0 %v2384_v1  ;;  %v2335_v2 = vld [vmem:[%s2777_s1 + $0x8] sm:$0xff]   ;;  %v2337_v4 = vld [vmem:[%s2777_s1] sm:$0xff]   ;;  %s1975_s13 = sshll.u32 %s2790_s22, 2  ;;  %vm619_vm2 = vcmask 64512   ;;  %vm685_vm3 = vcmask 1043456   ;;  %v2341_v42 = vld [vmem:[%s2777_s1 + $0x18] sm:$0xff]  }
   0xd   : > { %2165 = vmatpush3.bf16.msra.mxu1 %v2334_v0  ;;  %2168 = vmatprep.mubr.msk.bf16.mxu1 %vm2385_vm0, %v2384_v1  ;;  %s412_s16 = scalar_lea.vmem %s2776_s0, %s1975_s13  ;;  %v1983_v6 = vld [vmem:[%s2781_s5] ss:$0 sm:$0xff]  ;;  %v2338_v21 = vld [vmem:[%s2779_s3 + $0x8] sm:$0xff]   ;;  %v2343_v43 = vld [vmem:[%s2777_s1 + $0x10] sm:$0xff]   ;;  %vm679_vm4 = vcmask 60416   ;;  %s416_s14 = scalar_lea.vmem %s2787_s11, %s1975_s13  ;;  %vm1882_vm5 = vcmask 257024  }
   0xe   : > { %2157 = vmatpush3.bf16.msra.mxu0 %v2335_v2  ;;  %2166 = vmatprep.subr.bf16.mxu1 %v2384_v1  ;;  %v2488_v5 = vld [vmem:[%s412_s16] sm:$0xf]  ;;  %s2095_s16 = sshll.u32 %s2790_s22, 4  ;;  %v2340_v47 = vld [vmem:[%s2778_s2 + $0x18] sm:$0xff]   ;;  %v2342_v49 = vld [vmem:[%s2778_s2 + $0x10] sm:$0xff]  }
   0xf   : > { %2158 = vmatprep.subr.bf16.mxu0 %v2384_v1  ;;  %2160 = vmatprep.mubr.msk.bf16.mxu0 %vm2385_vm0, %v2384_v1  ;;  %v1979_v10 = vld [vmem:[%s2780_s4] ss:$0 sm:$0xff]  ;;  %s2545_s19 = scalar_lea.vmem %s2788_s12, %s2095_s16  ;;  %v2007_v58 = vld [vmem:[%s2781_s5 + $0x1] ss:$0 sm:$0xff] }
  0x10   : > { %v2339_v22 = vld [vmem:[%s2779_s3] sm:$0xff]  }
  0x11   : > { %2167 = vmatpush3.bf16.msra.mxu1 %v2336_v3  ;;  %v1987_v34 = vld [vmem:[%s2782_s6] ss:$0 sm:$0xff]  ;;  %v1998_v61 = vld [vmem:[%s2780_s4 + $0x1] ss:$0 sm:$0xff] }
  0x12   : > { %2159 = vmatpush3.bf16.msra.mxu0 %v2337_v4  ;;  %2180 = vmatprep.subr.bf16.mxu1 %v2384_v1 }
  0x13   : > { %2172 = vmatprep.subr.bf16.mxu0 %v2384_v1 }
  0x14   : > { %2169 = vmatmul.mubr.msk.bf16.vlgmr.msra.gmra.mxu1 %vm447_vm1, %v2488_v5 }
  0x15   : > { %2161 = vmatmul.mubr.msk.bf16.vlgmr.msra.gmra.mxu0 %vm447_vm1, %v2488_v5  ;;  %2182 = vmatprep.mubr.msk.bf16.mxu1 %vm2385_vm0, %v2384_v1 }
  0x16   : > { %2176 = vmatprep.mubr.msk.bf16.mxu0 %vm2385_vm0, %v2384_v1  ;;  %2173 = vmatpush3.bf16.msra.mxu0 %v2338_v21 }
  0x17   : > { %2174 = vmatprep.subr.bf16.mxu0 %v2384_v1 }
  0x1a   : > { %2175 = vmatpush3.bf16.msra.mxu0 %v2339_v22 }
  0x1b   : > { %2186 = vmatprep.subr.bf16.mxu0 %v2384_v1 }
  0x1d   : > { %2177 = vmatmul.mubr.msk.bf16.vlgmr.msra.gmra.mxu0 %vm447_vm1, %v2488_v5 }
  0x1e   : > { %2188 = vmatprep.mubr.msk.bf16.mxu0 %vm2385_vm0, %v2384_v1 }
  0xd4   : > { %v548_v7 = vpop.f32.mrf.mxu1 }
  0xd5   : > { %v549_v8 = vadd.f32 %v1983_v6, %v548_v7  ;;  %v485_v9 = vpop.f32.mrf.mxu0  ;;  %v2344_v7 = vld [vmem:[%s2779_s3 + $0x18] sm:$0xff]  }
  0xd6   : > { %v2170_v11 = vpop.f32.mrf.mxu1  ;;  %v486_v16 = vadd.f32 %v1979_v10, %v485_v9 }
  0xd7   : > { %v618_v12 = vpack.c.bf16 %v549_v8, %v549_v8  ;;  %v2162_v13 = vpop.f32.mrf.mxu0  ;;  %v2345_v8 = vld [vmem:[%s2779_s3 + $0x10] sm:$0xff]  }
  0xd8   : > { %v551_v14 = vpop.f32.mrf.mxu1  ;;  %v617_v20 = vpack.c.bf16 %v486_v16, %v486_v16 }
  0xd9   : > { %v624_v15 = vsel %vm619_vm2, %v618_v12, 0  ;;  %v488_v17 = vpop.f32.mrf.mxu0 }
  0xda   : > { %v2171_v18 = vpop.f32.mrf.mxu1  ;;  %2181 = vmatpush3.bf16.xpose.msra.mxu1 %v624_v15  ;;  %v2016_v15 = vld [vmem:[%s2782_s6 + $0x1] ss:$0 sm:$0xff] }
  0xdb   : > { %v2163_v19 = vpop.f32.mrf.mxu0  ;;  %2192 = vmatprep.subr.bf16.mxu1 %v2384_v1 }
  0xdd   : > { %v611_v35 = vpop.f32.mrf.mxu0 }
  0xde   : > { %v612_v36 = vadd.f32 %v1987_v34, %v611_v35 }
  0xdf   : > { %v2178_v37 = vpop.f32.mrf.mxu0 }
  0xe0   : > { %v681_v38 = vpack.c.bf16 %v612_v36, %v612_v36  ;;  %v2346_v36 = vld [vmem:[%s2778_s2 + $0x28] sm:$0xff]  }
  0xe1   : > { %2183 = vmatmul.mubr.msk.bf16.vlgmr.msra.gmra.mxu1 %vm619_vm2, %v617_v20  ;;  %v614_v39 = vpop.f32.mrf.mxu0 }
  0xe2   : > { %2196 = vmatprep.mubr.msk.bf16.mxu1 %vm2385_vm0, %v2384_v1  ;;  %v687_v40 = vsel %vm685_vm3, %v681_v38, 0  ;;  %2193 = vmatpush3.bf16.msra.mxu1 %v2341_v42  ;;  %v2347_v38 = vld [vmem:[%s2778_s2 + $0x20] sm:$0xff]  }
  0xe3   : > { %v2179_v41 = vpop.f32.mrf.mxu0  ;;  %2187 = vmatpush3.bf16.msra.mxu0 %v687_v40  ;;  %2194 = vmatprep.subr.bf16.mxu1 %v2384_v1  ;;  %v2348_v40 = vld [vmem:[%s2777_s1 + $0x28] sm:$0xff]  }
  0xe4   : > { %2200 = vmatprep.subr.bf16.mxu0 %v2384_v1 }
  0xe6   : > { %2195 = vmatpush3.bf16.msra.mxu1 %v2343_v43 }
  0xe7   : > { %2208 = vmatprep.subr.bf16.mxu1 %v2384_v1 }
  0xe9   : > { %2197 = vmatmul.mubr.msk.bf16.vlgmr.msra.gmra.mxu1 %vm447_vm1, %v2488_v5 }
  0xea   : > { %2212 = vmatprep.mubr.msk.bf16.mxu1 %vm2385_vm0, %v2384_v1  ;;  %2209 = vmatpush3.bf16.msra.mxu1 %v2344_v7  ;;  %v2350_v7 = vld [vmem:[%s2779_s3 + $0x28] sm:$0xff]  }
  0xeb   : > { %2210 = vmatprep.subr.bf16.mxu1 %v2384_v1 }
  0xee   : > { %2211 = vmatpush3.bf16.msra.mxu1 %v2345_v8  ;;  %v2351_v8 = vld [vmem:[%s2779_s3 + $0x20] sm:$0xff]  }
  0xef   : > { %2222 = vmatprep.subr.bf16.mxu1 %v2384_v1 }
  0xf1   : > { %2213 = vmatmul.mubr.msk.bf16.vlgmr.msra.gmra.mxu1 %vm447_vm1, %v2488_v5 }
  0xf2   : > { %2224 = vmatprep.mubr.msk.bf16.mxu1 %vm2385_vm0, %v2384_v1 }
 0x1a1   : > { %v660_v23 = vpop.f32.mrf.mxu1 }
 0x1a2   : > { %v666_v24 = vmul.f32 0.35355338, %v660_v23 }
 0x1a3   : > { %v2184_v25 = vpop.f32.mrf.mxu1 }
 0x1a4   : > { %v667_v26 = vsel %vm619_vm2, %v666_v24, -inf }
 0x1a5   : > { %668 = vmax.xlane.f32.xlu0 %v667_v26  ;;  %v663_v27 = vpop.f32.mrf.mxu1 }
 0x1a7   : > { %v2185_v28 = vpop.f32.mrf.mxu1 }
 0x1a8   : > { %v2023_v28 = vld [vmem:[%s2783_s7 + $0x4] sm:$0xf] }
 0x1a9   : > { %v790_v50 = vpop.f32.mrf.mxu1 }
 0x1aa   : > { %v791_v3 = vadd.f32 %v1998_v61, %v790_v50  ;;  %v2040_v50 = vld [vmem:[%s2781_s5 + $0x2] ss:$0 sm:$0xff] }
 0x1ab   : > { %v2198_v51 = vpop.f32.mrf.mxu1 }
 0x1ac   : > { %v926_v6 = vpack.c.bf16 %v791_v3, %v791_v3 }
 0x1ad   : > { %v793_v52 = vpop.f32.mrf.mxu1 }
 0x1af   : > { %v2199_v53 = vpop.f32.mrf.mxu1 }
 0x1b1   : > { %v920_v16 = vpop.f32.mrf.mxu1 }
 0x1b2   : > { %v921_v17 = vadd.f32 %v2016_v15, %v920_v16 }
 0x1b3   : > { %v2214_v18 = vpop.f32.mrf.mxu1 }
 0x1b4   : > { %v989_v19 = vpack.c.bf16 %v921_v17, %v921_v17 }
 0x1b5   : > { %v923_v20 = vpop.f32.mrf.mxu1 }
 0x1b6   : > { %v994_v21 = vsel %vm685_vm3, %v989_v19, 0  ;;  %v2049_v20 = vld [vmem:[%s2782_s6 + $0x2] ss:$0 sm:$0xff] }
 0x1b7   : > { %v2215_v22 = vpop.f32.mrf.mxu1  ;;  %2223 = vmatpush3.bf16.msra.mxu1 %v994_v21 }
 0x1b8   : > { %2234 = vmatprep.subr.bf16.mxu1 %v2384_v1 }
 0x22e   : > { %v669_v29 = vpop.xlane.xlu0 %668 }
 0x22f   : > { %v670_v30 = vsub.f32 %v666_v24, %v669_v29  ;;  %v1043_v29 = vsel %vm685_vm3, %v2023_v28, 0  ;;  %v2056_v28 = vld [vmem:[%s2783_s7 + $0x8] sm:$0xf] }
 0x231   : > { %v671_v31 = vmul.f32 1.442695, %v670_v30 }
 0x233   : > { %2358 = vpow2.f32 %v671_v31 }
 0x240   : > { %v2359_v32 = vpop.eup %2358 }
 0x241   : > { %v673_v33 = vsel %vm619_vm2, %v2359_v32, 0.0 }
 0x242   : > { %674 = vadd.xlane.f32.xlu0 %v673_v33 }
 0x2cb   : > { %v675_v44 = vpop.xlane.xlu0 %674 }
 0x2cc   : > { %2360 = vrcp.f32 %v675_v44  ;;  %v2349_v44 = vld [vmem:[%s2777_s1 + $0x20] sm:$0xff]  }
 0x2d9   : > { %v2361_v45 = vpop.eup %2360 }
 0x2da   : > { %v677_v46 = vmul.f32 %v2361_v45, %v2359_v32  ;;  %v730_v32 = vld [vmem:[%s2783_s7] sm:$0xf] }
 0x2db   : > { %v1089_v35 = vsel %vm685_vm3, %v730_v32, 0 }
 0x2dc   : > { %v678_v48 = vpack.c.bf16 %v677_v46, %v677_v46 }
 0x2de   : > { %680 = vst.msk [vmem:[%s2545_s19] sm:$0xf] %vm679_vm4, %v678_v48  ;;  %2189 = vmatmul.mubr.msk.bf16.vlgmr.msra.gmra.mxu0 %vm619_vm2, %v678_v48 }
 0x2df   : > { %2201 = vmatpush3.bf16.msra.mxu0 %v2340_v47  ;;  %2204 = vmatprep.mubr.msk.bf16.mxu0 %vm2385_vm0, %v2384_v1 }
 0x2e0   : > { %2202 = vmatprep.subr.bf16.mxu0 %v2384_v1 }
 0x2e3   : > { %2203 = vmatpush3.bf16.msra.mxu0 %v2342_v49 }
 0x2e4   : > { %2216 = vmatprep.subr.bf16.mxu0 %v2384_v1 }
 0x2e6   : > { %2205 = vmatmul.mubr.msk.bf16.vlgmr.msra.gmra.mxu0 %vm447_vm1, %v2488_v5 }
 0x2e7   : > { %2218 = vmatprep.mubr.msk.bf16.mxu0 %vm2385_vm0, %v2384_v1 }
 0x39e   : > { %v2564_v54 = vpop.f32.mrf.mxu0 }
 0x39f   : > { %v729_v37 = vpack.c.bf16 %v2564_v54, %v2564_v54 }
 0x3a0   : > { %v2190_v55 = vpop.f32.mrf.mxu0 }
 0x3a2   : > { %v726_v56 = vpop.f32.mrf.mxu0 }
 0x3a4   : > { %v2191_v57 = vpop.f32.mrf.mxu0 }
 0x3a6   : > { %v855_v59 = vpop.f32.mrf.mxu0 }
 0x3a7   : > { %v856_v60 = vadd.f32 %v2007_v58, %v855_v59 }
 0x3a8   : > { %v2206_v62 = vpop.f32.mrf.mxu0 }
 0x3a9   : > { %v927_v63 = vpack.c.bf16 %v856_v60, %v856_v60  ;;  %v2031_v62 = vld [vmem:[%s2780_s4 + $0x2] ss:$0 sm:$0xff] }
 0x3aa   : > { %v858_v0 = vpop.f32.mrf.mxu0 }
 0x3ab   : > { %v932_v2 = vsel %vm619_vm2, %v927_v63, 0 }
 0x3ac   : > { %v2207_v4 = vpop.f32.mrf.mxu0  ;;  %2217 = vmatpush3.bf16.xpose.msra.mxu0 %v932_v2 }
 0x3ad   : > { %2228 = vmatprep.subr.bf16.mxu0 %v2384_v1 }
 0x3b3   : > { %2219 = vmatmul.mubr.msk.bf16.vlgmr.msra.gmra.mxu0 %vm619_vm2, %v926_v6 }
 0x3b4   : > { %2230 = vmatprep.mubr.msk.bf16.mxu0 %vm2385_vm0, %v2384_v1  ;;  %2229 = vmatpush3.bf16.msra.mxu0 %v1043_v29  ;;  %v1443_v29 = vsel %vm685_vm3, %v2056_v28, 0 }
 0x3b5   : > { %2240 = vmatprep.subr.bf16.mxu0 %v2384_v1 }
 0x473   : > { %v968_v9 = vpop.f32.mrf.mxu0 }
 0x474   : > { %v974_v10 = vmul.f32 0.35355338, %v968_v9 }
 0x475   : > { %v2220_v11 = vpop.f32.mrf.mxu0 }
 0x476   : > { %v975_v12 = vsel %vm619_vm2, %v974_v10, -inf }
 0x477   : > { %976 = vmax.xlane.f32.xlu1 %v975_v12  ;;  %v971_v13 = vpop.f32.mrf.mxu0 }
 0x479   : > { %v2221_v14 = vpop.f32.mrf.mxu0 }
 0x500   : > { %v977_v23 = vpop.xlane.xlu1 %976 }
 0x501   : > { %v978_v24 = vsub.f32 %v974_v10, %v977_v23 }
 0x503   : > { %v979_v25 = vmul.f32 1.442695, %v978_v24 }
 0x505   : > { %2362 = vpow2.f32 %v979_v25 }
 0x512   : > { %v2363_v26 = vpop.eup %2362 }
 0x513   : > { %v981_v27 = vsel %vm619_vm2, %v2363_v26, 0.0 }
 0x514   : > { %982 = vadd.xlane.f32.xlu1 %v981_v27 }
 0x59d   : > { %v983_v30 = vpop.xlane.xlu1 %982 }
 0x59e   : > { %2364 = vrcp.f32 %v983_v30 }
 0x5ab   : > { %v2365_v31 = vpop.eup %2364 }
 0x5ac   : > { %v985_v33 = vmul.f32 %v2365_v31, %v2363_v26 }
 0x5ae   : > { %v986_v34 = vpack.c.bf16 %v985_v33, %v985_v33 }
 0x5b0   : > { %2021 = vst.msk [vmem:[%s2545_s19 + $0x4] sm:$0xf] %vm679_vm4, %v986_v34  ;;  %2225 = vmatmul.mubr.msk.bf16.vlgmr.msra.gmra.mxu1 %vm619_vm2, %v986_v34  ;;  %v2353_v34 = vld [vmem:[%s2777_s1 + $0x38] sm:$0xff]  }
 0x5b1   : > { %2235 = vmatpush3.bf16.msra.mxu1 %v1089_v35  ;;  %2236 = vmatprep.mubr.msk.bf16.mxu1 %vm2385_vm0, %v2384_v1  ;;  %v2355_v35 = vld [vmem:[%s2777_s1 + $0x30] sm:$0xff]  }
 0x5b2   : > { %2248 = vmatprep.subr.bf16.mxu1 %v2384_v1 }
 0x5b8   : > { %2237 = vmatmul.mubr.msk.bf16.vlgmr.msra.gmra.mxu1 %vm619_vm2, %v729_v37  ;;  %v2352_v37 = vld [vmem:[%s2778_s2 + $0x38] sm:$0xff]  }
 0x5b9   : > { %2249 = vmatpush3.bf16.msra.mxu1 %v2346_v36  ;;  %2252 = vmatprep.mubr.msk.bf16.mxu1 %vm2385_vm0, %v2384_v1 }
 0x5ba   : > { %2250 = vmatprep.subr.bf16.mxu1 %v2384_v1 }
 0x5bd   : > { %2251 = vmatpush3.bf16.msra.mxu1 %v2347_v38 }
 0x5be   : > { %2264 = vmatprep.subr.bf16.mxu1 %v2384_v1 }
 0x5c0   : > { %2253 = vmatmul.mubr.msk.bf16.vlgmr.msra.gmra.mxu1 %vm447_vm1, %v2488_v5 }
 0x5c1   : > { %2266 = vmatprep.mubr.msk.bf16.mxu1 %vm2385_vm0, %v2384_v1 }
 0x670   : > { %v1030_v39 = vpop.f32.mrf.mxu1 }
 0x671   : > { %v1036_v41 = vpack.c.bf16 %v1030_v39, %v1030_v39 }
 0x672   : > { %v2226_v42 = vpop.f32.mrf.mxu1 }
 0x673   : > { %2231 = vmatmul.mubr.msk.bf16.vlgmr.msra.gmra.mxu0 %vm619_vm2, %v1036_v41  ;;  %v2354_v41 = vld [vmem:[%s2778_s2 + $0x30] sm:$0xff]  }
 0x674   : > { %v1033_v43 = vpop.f32.mrf.mxu1  ;;  %2241 = vmatpush3.bf16.msra.mxu0 %v2348_v40  ;;  %2244 = vmatprep.mubr.msk.bf16.mxu0 %vm2385_vm0, %v2384_v1 }
 0x675   : > { %2242 = vmatprep.subr.bf16.mxu0 %v2384_v1 }
 0x676   : > { %v2227_v45 = vpop.f32.mrf.mxu1 }
 0x678   : > { %v2638_v46 = vpop.f32.mrf.mxu1  ;;  %2243 = vmatpush3.bf16.msra.mxu0 %v2349_v44 }
 0x679   : > { %2256 = vmatprep.subr.bf16.mxu0 %v2384_v1 }
 0x67a   : > { %v2238_v47 = vpop.f32.mrf.mxu1 }
 0x67b   : > { %2245 = vmatmul.mubr.msk.bf16.vlgmr.msra.gmra.mxu0 %vm447_vm1, %v2488_v5 }
 0x67c   : > { %v1128_v48 = vpop.f32.mrf.mxu1  ;;  %2260 = vmatprep.mubr.msk.bf16.mxu0 %vm2385_vm0, %v2384_v1  ;;  %2257 = vmatpush3.bf16.msra.mxu0 %v2350_v7 }
 0x67d   : > { %2258 = vmatprep.subr.bf16.mxu0 %v2384_v1 }
 0x67e   : > { %v2239_v49 = vpop.f32.mrf.mxu1 }
 0x680   : > { %v1255_v51 = vpop.f32.mrf.mxu1  ;;  %2259 = vmatpush3.bf16.msra.mxu0 %v2351_v8 }
 0x681   : > { %v1256_v52 = vadd.f32 %v2040_v50, %v1255_v51  ;;  %2270 = vmatprep.subr.bf16.mxu0 %v2384_v1 }
 0x682   : > { %v2254_v53 = vpop.f32.mrf.mxu1 }
 0x683   : > { %v1327_v54 = vpack.c.bf16 %v1256_v52, %v1256_v52  ;;  %2261 = vmatmul.mubr.msk.bf16.vlgmr.msra.gmra.mxu0 %vm447_vm1, %v2488_v5 }
 0x684   : > { %v1258_v55 = vpop.f32.mrf.mxu1  ;;  %2272 = vmatprep.mubr.msk.bf16.mxu0 %vm2385_vm0, %v2384_v1 }
 0x685   : > { %v1332_v56 = vsel %vm619_vm2, %v1327_v54, 0  ;;  %v2072_v54 = vld [vmem:[%s2781_s5 + $0x3] ss:$0 sm:$0xff] }
 0x686   : > { %v2255_v57 = vpop.f32.mrf.mxu1  ;;  %2265 = vmatpush3.bf16.xpose.msra.mxu1 %v1332_v56 }
 0x687   : > { %2276 = vmatprep.subr.bf16.mxu1 %v2384_v1 }
 0x733   : > { %v2650_v58 = vpop.f32.mrf.mxu0 }
 0x734   : > { %v1126_v48 = vadd.f32 %v2638_v46, %v2650_v58 }
 0x735   : > { %v2232_v59 = vpop.f32.mrf.mxu0 }
 0x736   : > { %v2063_v59 = vld [vmem:[%s2780_s4 + $0x3] ss:$0 sm:$0xff] }
 0x737   : > { %v1082_v60 = vpop.f32.mrf.mxu0 }
 0x739   : > { %v2233_v61 = vpop.f32.mrf.mxu0 }
 0x73b   : > { %v1190_v63 = vpop.f32.mrf.mxu0 }
 0x73c   : > { %v1191_v0 = vadd.f32 %v2031_v62, %v1190_v63 }
 0x73d   : > { %v2246_v2 = vpop.f32.mrf.mxu0 }
 0x73e   : > { %v1326_v3 = vpack.c.bf16 %v1191_v0, %v1191_v0  ;;  %v2356_v0 = vld [vmem:[%s2779_s3 + $0x38] sm:$0xff]   ;;  %v2357_v2 = vld [vmem:[%s2779_s3 + $0x30] sm:$0xff]  }
 0x73f   : > { %v1193_v4 = vpop.f32.mrf.mxu0 }
 0x740   : > { %2267 = vmatmul.mubr.msk.bf16.vlgmr.msra.gmra.mxu1 %vm619_vm2, %v1326_v3 }
 0x741   : > { %v2247_v6 = vpop.f32.mrf.mxu0  ;;  %2278 = vmatprep.mubr.msk.bf16.mxu1 %vm2385_vm0, %v2384_v1  ;;  %2277 = vmatpush3.bf16.msra.mxu1 %v1443_v29 }
 0x742   : > { %2290 = vmatprep.subr.bf16.mxu1 %v2384_v1 }
 0x743   : > { %v1320_v21 = vpop.f32.mrf.mxu0 }
 0x744   : > { %v1321_v22 = vadd.f32 %v2049_v20, %v1320_v21 }
 0x745   : > { %v2262_v23 = vpop.f32.mrf.mxu0 }
 0x746   : > { %v1389_v24 = vpack.c.bf16 %v1321_v22, %v1321_v22  ;;  %v2088_v22 = vld [vmem:[%s2783_s7 + $0xc] sm:$0xf] }
 0x747   : > { %v1323_v25 = vpop.f32.mrf.mxu0  ;;  %v1798_v23 = vsel %vm685_vm3, %v2088_v22, 0 }
 0x748   : > { %v1394_v26 = vsel %vm685_vm3, %v1389_v24, 0 }
 0x749   : > { %v2263_v27 = vpop.f32.mrf.mxu0  ;;  %2271 = vmatpush3.bf16.msra.mxu0 %v1394_v26 }
 0x74a   : > { %2282 = vmatprep.subr.bf16.mxu0 %v2384_v1 }
 0x800   : > { %v1368_v9 = vpop.f32.mrf.mxu1 }
 0x801   : > { %v1374_v10 = vmul.f32 0.35355338, %v1368_v9 }
 0x802   : > { %v2268_v11 = vpop.f32.mrf.mxu1 }
 0x803   : > { %v1375_v12 = vsel %vm619_vm2, %v1374_v10, -inf }
 0x804   : > { %1376 = vmax.xlane.f32.xlu0 %v1375_v12  ;;  %v1371_v13 = vpop.f32.mrf.mxu1 }
 0x806   : > { %v2269_v14 = vpop.f32.mrf.mxu1 }
 0x88d   : > { %v1377_v15 = vpop.xlane.xlu0 %1376 }
 0x88e   : > { %v1378_v16 = vsub.f32 %v1374_v10, %v1377_v15 }
 0x890   : > { %v1379_v17 = vmul.f32 1.442695, %v1378_v16 }
 0x892   : > { %2366 = vpow2.f32 %v1379_v17 }
 0x89f   : > { %v2367_v18 = vpop.eup %2366 }
 0x8a0   : > { %v1381_v19 = vsel %vm619_vm2, %v2367_v18, 0.0 }
 0x8a1   : > { %1382 = vadd.xlane.f32.xlu1 %v1381_v19 }
 0x92a   : > { %v1383_v30 = vpop.xlane.xlu1 %1382 }
 0x92b   : > { %2368 = vrcp.f32 %v1383_v30 }
 0x938   : > { %v2369_v31 = vpop.eup %2368 }
 0x939   : > { %v1385_v32 = vmul.f32 %v2369_v31, %v2367_v18 }
 0x93b   : > { %v1386_v33 = vpack.c.bf16 %v1385_v32, %v1385_v32 }
 0x93d   : > { %2054 = vst.msk [vmem:[%s2545_s19 + $0x8] sm:$0xf] %vm679_vm4, %v1386_v33  ;;  %2273 = vmatmul.mubr.msk.bf16.vlgmr.msra.gmra.mxu0 %vm619_vm2, %v1386_v33 }
 0x93e   : > { %2286 = vmatprep.mubr.msk.bf16.mxu0 %vm2385_vm0, %v2384_v1  ;;  %2283 = vmatpush3.bf16.msra.mxu0 %v2353_v34  ;;  %v2090_v34 = vld [vmem:[%s2784_s8] ss:$0 sm:$0xff] }
 0x93f   : > { %2284 = vmatprep.subr.bf16.mxu0 %v2384_v1 }
 0x942   : > { %2285 = vmatpush3.bf16.msra.mxu0 %v2355_v35 }
 0x943   : > { %2298 = vmatprep.subr.bf16.mxu0 %v2384_v1 }
 0x945   : > { %2287 = vmatmul.mubr.msk.bf16.vlgmr.msra.gmra.mxu0 %vm447_vm1, %v2488_v5 }
 0x946   : > { %2302 = vmatprep.mubr.msk.bf16.mxu0 %vm2385_vm0, %v2384_v1  ;;  %2299 = vmatpush3.bf16.msra.mxu0 %v2356_v0 }
 0x947   : > { %2300 = vmatprep.subr.bf16.mxu0 %v2384_v1 }
 0x94a   : > { %2301 = vmatpush3.bf16.msra.mxu0 %v2357_v2 }
 0x94b   : > { %2312 = vmatprep.subr.bf16.mxu0 %v2384_v1 }
 0x94d   : > { %2303 = vmatmul.mubr.msk.bf16.vlgmr.msra.gmra.mxu0 %vm447_vm1, %v2488_v5 }
 0x94e   : > { %2314 = vmatprep.mubr.msk.bf16.mxu0 %vm2385_vm0, %v2384_v1 }
 0x9fd   : > { %v1430_v36 = vpop.f32.mrf.mxu0 }
 0x9fe   : > { %v1436_v38 = vpack.c.bf16 %v1430_v36, %v1430_v36  ;;  %v1849_v36 = vunpack.c.l.bf16 %v2488_v5 }
 0x9ff   : > { %v2274_v39 = vpop.f32.mrf.mxu0 }
 0xa00   : > { %2279 = vmatmul.mubr.msk.bf16.vlgmr.msra.gmra.mxu1 %vm619_vm2, %v1436_v38 }
 0xa01   : > { %v1433_v40 = vpop.f32.mrf.mxu0  ;;  %2291 = vmatpush3.bf16.msra.mxu1 %v2352_v37  ;;  %2294 = vmatprep.mubr.msk.bf16.mxu1 %vm2385_vm0, %v2384_v1 }
 0xa02   : > { %2292 = vmatprep.subr.bf16.mxu1 %v2384_v1 }
 0xa03   : > { %v2275_v42 = vpop.f32.mrf.mxu0 }
 0xa05   : > { %2293 = vmatpush3.bf16.msra.mxu1 %v2354_v41  ;;  %v1545_v43 = vpop.f32.mrf.mxu0 }
 0xa06   : > { %2306 = vmatprep.subr.bf16.mxu1 %v2384_v1  ;;  %v1546_v58 = vadd.f32 %v2063_v59, %v1545_v43 }
 0xa07   : > { %v2288_v44 = vpop.f32.mrf.mxu0 }
 0xa08   : > { %2295 = vmatmul.mubr.msk.bf16.vlgmr.msra.gmra.mxu1 %vm447_vm1, %v2488_v5  ;;  %v1681_v63 = vpack.c.bf16 %v1546_v58, %v1546_v58 }
 0xa09   : > { %2308 = vmatprep.mubr.msk.bf16.mxu1 %vm2385_vm0, %v2384_v1  ;;  %v1548_v45 = vpop.f32.mrf.mxu0 }
 0xa0b   : > { %v2289_v47 = vpop.f32.mrf.mxu0 }
 0xa0d   : > { %v1675_v15 = vpop.f32.mrf.mxu0 }
 0xa0f   : > { %v2304_v17 = vpop.f32.mrf.mxu0 }
 0xa11   : > { %v1678_v19 = vpop.f32.mrf.mxu0 }
 0xa13   : > { %v2305_v21 = vpop.f32.mrf.mxu0 }
 0xac0   : > { %v1479_v49 = vpop.f32.mrf.mxu1 }
 0xac1   : > { %v2716_v50 = vadd.f32 %v1479_v49, %v1126_v48 }
 0xac2   : > { %v2280_v51 = vpop.f32.mrf.mxu1 }
 0xac4   : > { %v1482_v52 = vpop.f32.mrf.mxu1 }
 0xac5   : > { %v2091_v52 = vld [vmem:[%s2785_s9] ss:$0 sm:$0xff] }
 0xac6   : > { %v2281_v53 = vpop.f32.mrf.mxu1 }
 0xac8   : > { %v1610_v55 = vpop.f32.mrf.mxu1 }
 0xac9   : > { %v1611_v56 = vadd.f32 %v2072_v54, %v1610_v55  ;;  %v2092_v54 = vld [vmem:[%s2786_s10] ss:$0 sm:$0xff] }
 0xaca   : > { %v2296_v57 = vpop.f32.mrf.mxu1 }
 0xacb   : > { %v1682_v60 = vpack.c.bf16 %v1611_v56, %v1611_v56 }
 0xacc   : > { %v1613_v61 = vpop.f32.mrf.mxu1 }
 0xacd   : > { %v1687_v46 = vsel %vm619_vm2, %v1682_v60, 0 }
 0xace   : > { %v2297_v62 = vpop.f32.mrf.mxu1  ;;  %2307 = vmatpush3.bf16.xpose.msra.mxu1 %v1687_v46 }
 0xacf   : > { %2318 = vmatprep.subr.bf16.mxu1 %v2384_v1 }
 0xad5   : > { %2309 = vmatmul.mubr.msk.bf16.vlgmr.msra.gmra.mxu1 %vm619_vm2, %v1681_v63 }
 0xad6   : > { %2320 = vmatprep.mubr.msk.bf16.mxu1 %vm2385_vm0, %v2384_v1  ;;  %v2081_v1 = vld [vmem:[%s2782_s6 + $0x3] ss:$0 sm:$0xff]  ;;  %2319 = vmatpush3.bf16.msra.mxu1 %v1798_v23 }
 0xad7   : > { %v1676_v16 = vadd.f32 %v2081_v1, %v1675_v15 }
 0xad9   : > { %v1744_v18 = vpack.c.bf16 %v1676_v16, %v1676_v16 }
 0xadb   : > { %v1749_v20 = vsel %vm685_vm3, %v1744_v18, 0 }
 0xadc   : > { %2313 = vmatpush3.bf16.msra.mxu0 %v1749_v20 }
 0xb95   : > { %v1723_v3 = vpop.f32.mrf.mxu1 }
 0xb96   : > { %v1729_v4 = vmul.f32 0.35355338, %v1723_v3 }
 0xb97   : > { %v2310_v6 = vpop.f32.mrf.mxu1 }
 0xb98   : > { %v1730_v7 = vsel %vm619_vm2, %v1729_v4, -inf }
 0xb99   : > { %1731 = vmax.xlane.f32.xlu0 %v1730_v7  ;;  %v1726_v8 = vpop.f32.mrf.mxu1 }
 0xb9b   : > { %v2311_v9 = vpop.f32.mrf.mxu1 }
 0xc22   : > { %v1732_v10 = vpop.xlane.xlu0 %1731 }
 0xc23   : > { %v1733_v11 = vsub.f32 %v1729_v4, %v1732_v10 }
 0xc25   : > { %v1734_v12 = vmul.f32 1.442695, %v1733_v11 }
 0xc27   : > { %2370 = vpow2.f32 %v1734_v12 }
 0xc34   : > { %v2371_v13 = vpop.eup %2370 }
 0xc35   : > { %v1736_v14 = vsel %vm619_vm2, %v2371_v13, 0.0 }
 0xc36   : > { %1737 = vadd.xlane.f32.xlu1 %v1736_v14 }
 0xcbf   : > { %v1738_v24 = vpop.xlane.xlu1 %1737 }
 0xcc0   : > { %2372 = vrcp.f32 %v1738_v24 }
 0xccd   : > { %v2373_v25 = vpop.eup %2372 }
 0xcce   : > { %v1740_v26 = vmul.f32 %v2373_v25, %v2371_v13 }
 0xcd0   : > { %v1741_v27 = vpack.c.bf16 %v1740_v26, %v1740_v26 }
 0xcd2   : > { %2086 = vst.msk [vmem:[%s2545_s19 + $0xc] sm:$0xf] %vm679_vm4, %v1741_v27  ;;  %2315 = vmatmul.mubr.msk.bf16.vlgmr.msra.gmra.mxu0 %vm619_vm2, %v1741_v27 }
 0xd92   : > { %v1785_v28 = vpop.f32.mrf.mxu0 }
 0xd93   : > { %v1791_v29 = vpack.c.bf16 %v1785_v28, %v1785_v28 }
 0xd94   : > { %v2316_v30 = vpop.f32.mrf.mxu0 }
 0xd95   : > { %2321 = vmatmul.mubr.msk.bf16.vlgmr.msra.gmra.mxu1 %vm619_vm2, %v1791_v29 }
 0xd96   : > { %v1788_v31 = vpop.f32.mrf.mxu0 }
 0xd98   : > { %v2317_v32 = vpop.f32.mrf.mxu0 }
 0xe55   : > { %v1834_v33 = vpop.f32.mrf.mxu1 }
 0xe56   : > { %v1840_v35 = vadd.f32 %v1834_v33, %v2716_v50 }
 0xe57   : > { %v2322_v37 = vpop.f32.mrf.mxu1 }
 0xe58   : > { %v1848_v38 = vadd.f32 %v2090_v34, %v1840_v35 }
 0xe59   : > { %v1837_v39 = vpop.f32.mrf.mxu1 }
 0xe5a   : > { %v1850_v40 = vadd.f32 %v1849_v36, %v1848_v38 }
 0xe5b   : > { %v2323_v41 = vpop.f32.mrf.mxu1 }
 0xe5c   : > { %v1851_v42 = vsel %vm447_vm1, %v1850_v40, 0.0 }
 0xe5d   : > { %1852 = vadd.xlane.f32.xlu0 %v1851_v42 }
 0xee6   : > { %v1853_v43 = vpop.xlane.xlu0 %1852 }
 0xee7   : > { %v1855_v44 = vmul.f32 0.03125, %v1853_v43 }
 0xee9   : > { %v1856_v45 = vsub.f32 %v1850_v40, %v1855_v44 }
 0xeeb   : > { %v1857_v47 = vmul.f32 %v1856_v45, %v1856_v45 }
 0xeed   : > { %v1858_v48 = vsel %vm447_vm1, %v1857_v47, 0.0 }
 0xeee   : > { %1859 = vadd.xlane.f32.xlu1 %v1858_v48 }
 0xf77   : > { %v1860_v49 = vpop.xlane.xlu1 %1859 }
 0xf78   : > { %v1861_v50 = vmul.f32 0.03125, %v1860_v49 }
 0xf7a   : > { %v1862_v51 = vadd.f32 1e-05, %v1861_v50 }
 0xf7c   : > { %2374 = vrsqrt.f32 %v1862_v51 }
 0xf89   : > { %v2375_v5 = vpop.eup %2374 }
 0xf8a   : > { %v1864_v53 = vmul.f32 %v2375_v5, %v1856_v45 }
 0xf8c   : > { %v1872_v55 = vmul.f32 %v2091_v52, %v1864_v53 }
 0xf8e   : > { %v1880_v56 = vadd.f32 %v2092_v54, %v1872_v55 }
 0xf90   : > { %v1881_v57 = vpack.c.bf16 %v1880_v56, %v1880_v56 }
 0xf92   : > { %1883 = vst.msk [vmem:[%s416_s14] sm:$0xf] %vm1882_vm5, %v1881_v57 }
 0xf93 PF: > { %s23_s21 = sadd.s32 1, %s2382_s21  }
 0xf94   : > { %p20_p4 = scmp.ge.s32.totalorder %s23_s21, 4  }
 0xf96   :  { %22 = sbr.rel (!%p20_p4) target bundleno = 1 (0x1), region = 130 }

</bundles_post_ra>
